<compile_context>
chip_gen: v7x
topology: tpu7x:2x2x1
jax: 0.10.0
libtpu: 0.0.40
codegen_flags: <defaults>
</compile_context>

<pallas_src>
import functools

import jax
import jax.numpy as jnp
from jax import lax
from jax.experimental import pallas as pl
from jax.experimental.pallas import tpu as pltpu


def _lstm_last_linear_kernel(x_ref, wih_ref, whh_ref, b_ref, wout_ref, bout_ref,
                             out_ref, xproj_ref, *, hidden_dim, seq_len, input_size):
    """Whole-sequence LSTM + last-step Linear, single kernel invocation.

    x_ref:     (T, B, I)   f32  time-major input (wrapper swaps axes)
    wih_ref:   (I, 4H)     f32  == W_ih^T
    whh_ref:   (H, 4H)     bf16 == W_hh^T (bf16 MXU operands, f32 accumulate)
    b_ref:     (1, 4H)     f32  == b_ih + b_hh
    wout_ref:  (1, H)      f32  == W_out row
    bout_ref:  (1, 1)      f32
    out_ref:   (B, 1)      f32
    xproj_ref: (T, B, 4H)  f32  VMEM scratch holding the hoisted input projection
    """
    H, T, I = hidden_dim, seq_len, input_size
    B = x_ref.shape[1]

    # ---- phase 1: hoisted input projection (no serial dependence) -------------------------
    # K == I == 3: three VPU broadcast multiply-adds beat an MXU matmul that would use 3/256
    # of the K dimension and still pay push/drain latency; also leaves the MXU pipeline free.
    x = x_ref[...]                                                  # (T, B, I)
    xproj = jnp.zeros((T, B, 4 * H), jnp.float32) + b_ref[...]      # bias folded in once
    for k in range(I):                                              # I tiny and static
        xproj = xproj + x[:, :, k:k + 1] * wih_ref[k:k + 1, :]
    # Stage in VMEM: per-step reads become scheduled streaming loads of one (B, 4H) tile,
    # instead of 32 vregs of x_proj held live across the whole recurrence (spill pressure,
    # worst on v5e's single vst slot).
    xproj_ref[...] = xproj

    # ---- phase 2: serial recurrence — small MXU matmul + VPU/EUP gate math per step -------
    def step(t, carry):
        h, c = carry
        # W_hh read from the ref inside the step (not hoisted to a register-resident value);
        # bf16 operands, f32 accumulation.  Gate/state math stays f32.
        gates = xproj_ref[t] + jnp.dot(h.astype(jnp.bfloat16), whh_ref[...],
                                       preferred_element_type=jnp.float32)   # (B, 4H)
        # PyTorch gate order [i, f, g, o]; H == 128 so slices are lane-aligned.
        i_g = jax.nn.sigmoid(gates[:, 0 * H:1 * H])
        f_g = jax.nn.sigmoid(gates[:, 1 * H:2 * H])
        g_g = jnp.tanh(gates[:, 2 * H:3 * H])
        o_g = jax.nn.sigmoid(gates[:, 3 * H:4 * H])
        c_new = f_g * c + i_g * g_g
        h_new = o_g * jnp.tanh(c_new)
        return h_new, c_new

    h0 = jnp.zeros((B, H), jnp.float32)
    c0 = jnp.zeros((B, H), jnp.float32)
    h_last, _ = lax.fori_loop(0, T, step, (h0, c0), unroll=True)

    # ---- final Linear(H -> 1): VPU multiply + lane reduction (skip an N=1 MXU matmul) ------
    out_ref[...] = (jnp.sum(h_last * wout_ref[...], axis=-1, keepdims=True)
                    + bout_ref[...])


def net_forward(x_btf, params):
    """x_btf: (B, T, I) float32 (PyTorch batch_first layout). Returns (B, 1)."""
    B, T, I = x_btf.shape
    H = params["w_hh"].shape[0]                                   # w_hh stored as (H, 4H)

    x_tbf = jnp.swapaxes(x_btf, 0, 1)                             # (T, B, I), tiny & free
    w_ih_t = params["w_ih"]                                       # (I, 4H)  == W_ih^T
    w_hh_bf16 = params["w_hh"].astype(jnp.bfloat16)               # (H, 4H)  == W_hh^T, MXU operand
    b = (params["b_ih"] + params["b_hh"]).reshape(1, 4 * H)       # (1, 4H)
    w_out_row = params["w_out"].reshape(1, H)                     # (1, H)
    b_out = params["b_out"].reshape(1, 1)                         # (1, 1)

    kernel = functools.partial(_lstm_last_linear_kernel,
                               hidden_dim=H, seq_len=T, input_size=I)

    vmem = pl.BlockSpec(memory_space=pltpu.MemorySpace.VMEM)
    return pl.pallas_call(
        kernel,
        out_shape=jax.ShapeDtypeStruct((B, 1), jnp.float32),
        in_specs=[vmem] * 6,                                      # whole arrays resident in VMEM
        out_specs=vmem,
        scratch_shapes=[pltpu.VMEM((T, B, 4 * H), jnp.float32)],  # staged input projection
    )(x_tbf, w_ih_t, w_hh_bf16, b, w_out_row, b_out)


def net_forward_ref(x_btf, params):
    """Pure-JAX f32 reference (lax.scan LSTM, HIGHEST matmul precision)."""
    B, T, I = x_btf.shape
    H = params["w_hh"].shape[0]
    w_ih_t, w_hh_t = params["w_ih"], params["w_hh"]
    b = params["b_ih"] + params["b_hh"]

    def step(carry, x_t):
        h, c = carry
        gates = (jnp.dot(x_t, w_ih_t, precision=lax.Precision.HIGHEST)
                 + jnp.dot(h, w_hh_t, precision=lax.Precision.HIGHEST) + b)
        i_g = jax.nn.sigmoid(gates[:, 0 * H:1 * H])
        f_g = jax.nn.sigmoid(gates[:, 1 * H:2 * H])
        g_g = jnp.tanh(gates[:, 2 * H:3 * H])
        o_g = jax.nn.sigmoid(gates[:, 3 * H:4 * H])
        c_new = f_g * c + i_g * g_g
        h_new = o_g * jnp.tanh(c_new)
        return (h_new, c_new), None

    h0 = jnp.zeros((B, H), jnp.float32)
    c0 = jnp.zeros((B, H), jnp.float32)
    (h_last, _), _ = lax.scan(step, (h0, c0), jnp.transpose(x_btf, (1, 0, 2)))
    return (jnp.dot(h_last, params["w_out"], precision=lax.Precision.HIGHEST)
            + params["b_out"].reshape(1, 1))


def init_params(key, input_size, hidden_dim):
    """Deterministic PyTorch-style init: U(-1/sqrt(H), 1/sqrt(H)).

    Note: weights are stored pre-transposed ((I,4H)/(H,4H)/(H,1)); real PyTorch state_dict
    weights must be transposed before use.
    """
    bound = 1.0 / jnp.sqrt(jnp.float32(hidden_dim))
    ks = jax.random.split(key, 6)
    u = lambda k, shape: jax.random.uniform(k, shape, jnp.float32, -bound, bound)
    return {
        "w_ih": u(ks[0], (input_size, 4 * hidden_dim)),   # W_ih^T
        "w_hh": u(ks[1], (hidden_dim, 4 * hidden_dim)),   # W_hh^T
        "b_ih": u(ks[2], (4 * hidden_dim,)),
        "b_hh": u(ks[3], (4 * hidden_dim,)),
        "w_out": u(ks[4], (hidden_dim, 1)),               # W_out^T
        "b_out": u(ks[5], (1,)),
    }


if __name__ == "__main__":
    # input_size=3 (module default), hidden_dim=128 (script global), num_layers=1, mode='LSTM'.
    # B=8 (sublane multiple), T=8; H=128 keeps gate slices lane-aligned.
    B, T, I, H = 8, 8, 3, 128

    key = jax.random.PRNGKey(0)
    kx, kp = jax.random.split(key)
    x = jax.random.normal(kx, (B, T, I), jnp.float32)     # batch_first, like the PyTorch input
    params = init_params(kp, I, H)

    out = jax.block_until_ready(net_forward(x, params))
    ref = net_forward_ref(x, params)

    assert out.shape == (B, 1), out.shape
    # The recurrence matmul uses bf16 MXU operands (f32 accumulate) per perf feedback;
    # expected deviation vs the f32 reference is ~1e-3, so validate at 2e-2.
    assert jnp.allclose(out, ref, atol=2e-2, rtol=2e-2), (out, ref)

    print("KERNEL_OK")
</pallas_src>

<mosaic_0001>
module attributes {stable_mosaic.version = 11 : i64} {
  func.func @_lstm_last_linear_kernel(%arg0: memref<8x8x3xf32, #tpu.memory_space<vmem>>, %arg1: memref<3x512xf32, #tpu.memory_space<vmem>>, %arg2: memref<128x512xbf16, #tpu.memory_space<vmem>>, %arg3: memref<1x512xf32, #tpu.memory_space<vmem>>, %arg4: memref<1x128xf32, #tpu.memory_space<vmem>>, %arg5: memref<1x1xf32, #tpu.memory_space<vmem>>, %arg6: memref<8x1xf32, #tpu.memory_space<vmem>>, %arg7: memref<8x8x512xf32, #tpu.memory_space<vmem>>) attributes {dimension_semantics = [], scalar_prefetch = 0 : i64, scratch_operands = 1 : i64, tpu.core_type = #tpu.core_type<tc>} {
    %c0 = arith.constant 0 : index
    %c0_0 = arith.constant 0 : index
    %c0_1 = arith.constant 0 : index
    %0 = vector.load %arg0[%c0, %c0_0, %c0_1] : memref<8x8x3xf32, #tpu.memory_space<vmem>>, vector<8x8x3xf32>
    %cst = arith.constant 0.000000e+00 : f32
    %1 = vector.broadcast %cst : f32 to vector<8x8x512xf32>
    %c0_2 = arith.constant 0 : index
    %c0_3 = arith.constant 0 : index
    %2 = vector.load %arg3[%c0_2, %c0_3] : memref<1x512xf32, #tpu.memory_space<vmem>>, vector<1x512xf32>
    %3 = vector.shape_cast %2 : vector<1x512xf32> to vector<1x1x512xf32>
    %4 = vector.broadcast %3 : vector<1x1x512xf32> to vector<8x8x512xf32>
    %5 = arith.addf %1, %4 : vector<8x8x512xf32>
    %6 = vector.extract_strided_slice %0 {offsets = [0, 0, 0], sizes = [8, 8, 1], strides = [1, 1, 1]} : vector<8x8x3xf32> to vector<8x8x1xf32>
    %c0_4 = arith.constant 0 : index
    %c0_5 = arith.constant 0 : index
    %7 = vector.load %arg1[%c0_4, %c0_5] : memref<3x512xf32, #tpu.memory_space<vmem>>, vector<1x512xf32>
    %8 = vector.shape_cast %7 : vector<1x512xf32> to vector<1x1x512xf32>
    %9 = vector.broadcast %6 : vector<8x8x1xf32> to vector<8x8x512xf32>
    %10 = vector.broadcast %8 : vector<1x1x512xf32> to vector<8x8x512xf32>
    %11 = arith.mulf %9, %10 : vector<8x8x512xf32>
    %12 = arith.addf %5, %11 : vector<8x8x512xf32>
    %13 = vector.extract_strided_slice %0 {offsets = [0, 0, 1], sizes = [8, 8, 1], strides = [1, 1, 1]} : vector<8x8x3xf32> to vector<8x8x1xf32>
    %c1 = arith.constant 1 : index
    %c0_6 = arith.constant 0 : index
    %14 = vector.load %arg1[%c1, %c0_6] : memref<3x512xf32, #tpu.memory_space<vmem>>, vector<1x512xf32>
    %15 = vector.shape_cast %14 : vector<1x512xf32> to vector<1x1x512xf32>
    %16 = vector.broadcast %13 : vector<8x8x1xf32> to vector<8x8x512xf32>
    %17 = vector.broadcast %15 : vector<1x1x512xf32> to vector<8x8x512xf32>
    %18 = arith.mulf %16, %17 : vector<8x8x512xf32>
    %19 = arith.addf %12, %18 : vector<8x8x512xf32>
    %20 = vector.extract_strided_slice %0 {offsets = [0, 0, 2], sizes = [8, 8, 1], strides = [1, 1, 1]} : vector<8x8x3xf32> to vector<8x8x1xf32>
    %c2 = arith.constant 2 : index
    %c0_7 = arith.constant 0 : index
    %21 = vector.load %arg1[%c2, %c0_7] : memref<3x512xf32, #tpu.memory_space<vmem>>, vector<1x512xf32>
    %22 = vector.shape_cast %21 : vector<1x512xf32> to vector<1x1x512xf32>
    %23 = vector.broadcast %20 : vector<8x8x1xf32> to vector<8x8x512xf32>
    %24 = vector.broadcast %22 : vector<1x1x512xf32> to vector<8x8x512xf32>
    %25 = arith.mulf %23, %24 : vector<8x8x512xf32>
    %26 = arith.addf %19, %25 : vector<8x8x512xf32>
    %c0_8 = arith.constant 0 : index
    %c0_9 = arith.constant 0 : index
    %c0_10 = arith.constant 0 : index
    %27 = vector.load %arg7[%c0_8, %c0_9, %c0_10] : memref<8x8x512xf32, #tpu.memory_space<vmem>>, vector<8x8x512xf32>
    tpu.vector_store %arg7[%c0_8, %c0_9, %c0_10], %26 {strides = array<i32>} : memref<8x8x512xf32, #tpu.memory_space<vmem>>, vector<8x8x512xf32>,
    %cst_11 = arith.constant 0.000000e+00 : f32
    %28 = vector.broadcast %cst_11 : f32 to vector<8x128xf32>
    %cst_12 = arith.constant 0.000000e+00 : f32
    %29 = vector.broadcast %cst_12 : f32 to vector<8x128xf32>
    %c0_i32 = arith.constant 0 : i32
    %30 = arith.index_cast %c0_i32 : i32 to index
    %c0_13 = arith.constant 0 : index
    %c0_14 = arith.constant 0 : index
    %31 = vector.load %arg7[%30, %c0_13, %c0_14] : memref<8x8x512xf32, #tpu.memory_space<vmem>>, vector<1x8x512xf32>
    %32 = vector.shape_cast %31 : vector<1x8x512xf32> to vector<8x512xf32>
    %33 = arith.truncf %28 : vector<8x128xf32> to vector<8x128xbf16>
    %c0_15 = arith.constant 0 : index
    %c0_16 = arith.constant 0 : index
    %34 = vector.load %arg2[%c0_15, %c0_16] : memref<128x512xbf16, #tpu.memory_space<vmem>>, vector<128x512xbf16>
    %cst_17 = arith.constant dense<0.000000e+00> : vector<8x512xf32>
    %35 = tpu.matmul %33, %34, %cst_17 {dimension_numbers = #tpu.dot_dimension_numbers<[1], [0], [0], [1], [0, 0, 1, 1], [], []>} : vector<8x128xbf16>, vector<128x512xbf16>, vector<8x512xf32> -> vector<8x512xf32>
    %36 = arith.addf %32, %35 : vector<8x512xf32>
    %37 = vector.extract_strided_slice %36 {offsets = [0, 0], sizes = [8, 128], strides = [1, 1]} : vector<8x512xf32> to vector<8x128xf32>
    %38 = arith.negf %37 : vector<8x128xf32>
    %39 = math.exp %38 : vector<8x128xf32>
    %cst_18 = arith.constant 1.000000e+00 : f32
    %40 = vector.broadcast %cst_18 : f32 to vector<8x128xf32>
    %41 = arith.addf %40, %39 : vector<8x128xf32>
    %42 = arith.divf %40, %41 : vector<8x128xf32>
    %43 = vector.extract_strided_slice %36 {offsets = [0, 128], sizes = [8, 128], strides = [1, 1]} : vector<8x512xf32> to vector<8x128xf32>
    %44 = arith.negf %43 : vector<8x128xf32>
    %45 = math.exp %44 : vector<8x128xf32>
    %cst_19 = arith.constant 1.000000e+00 : f32
    %46 = vector.broadcast %cst_19 : f32 to vector<8x128xf32>
    %47 = arith.addf %46, %45 : vector<8x128xf32>
    %48 = arith.divf %46, %47 : vector<8x128xf32>
    %49 = vector.extract_strided_slice %36 {offsets = [0, 256], sizes = [8, 128], strides = [1, 1]} : vector<8x512xf32> to vector<8x128xf32>
    %50 = math.tanh %49 : vector<8x128xf32>
    %51 = vector.extract_strided_slice %36 {offsets = [0, 384], sizes = [8, 128], strides = [1, 1]} : vector<8x512xf32> to vector<8x128xf32>
    %52 = arith.negf %51 : vector<8x128xf32>
    %53 = math.exp %52 : vector<8x128xf32>
    %cst_20 = arith.constant 1.000000e+00 : f32
    %54 = vector.broadcast %cst_20 : f32 to vector<8x128xf32>
    %55 = arith.addf %54, %53 : vector<8x128xf32>
    %56 = arith.divf %54, %55 : vector<8x128xf32>
    %57 = arith.mulf %48, %29 : vector<8x128xf32>
    %58 = arith.mulf %42, %50 : vector<8x128xf32>
    %59 = arith.addf %57, %58 : vector<8x128xf32>
    %60 = math.tanh %59 : vector<8x128xf32>
    %61 = arith.mulf %56, %60 : vector<8x128xf32>
    %c1_i32 = arith.constant 1 : i32
    %62 = arith.index_cast %c1_i32 : i32 to index
    %c0_21 = arith.constant 0 : index
    %c0_22 = arith.constant 0 : index
    %63 = vector.load %arg7[%62, %c0_21, %c0_22] : memref<8x8x512xf32, #tpu.memory_space<vmem>>, vector<1x8x512xf32>
    %64 = vector.shape_cast %63 : vector<1x8x512xf32> to vector<8x512xf32>
    %65 = arith.truncf %61 : vector<8x128xf32> to vector<8x128xbf16>
    %c0_23 = arith.constant 0 : index
    %c0_24 = arith.constant 0 : index
    %66 = vector.load %arg2[%c0_23, %c0_24] : memref<128x512xbf16, #tpu.memory_space<vmem>>, vector<128x512xbf16>
    %cst_25 = arith.constant dense<0.000000e+00> : vector<8x512xf32>
    %67 = tpu.matmul %65, %66, %cst_25 {dimension_numbers = #tpu.dot_dimension_numbers<[1], [0], [0], [1], [0, 0, 1, 1], [], []>} : vector<8x128xbf16>, vector<128x512xbf16>, vector<8x512xf32> -> vector<8x512xf32>
    %68 = arith.addf %64, %67 : vector<8x512xf32>
    %69 = vector.extract_strided_slice %68 {offsets = [0, 0], sizes = [8, 128], strides = [1, 1]} : vector<8x512xf32> to vector<8x128xf32>
    %70 = arith.negf %69 : vector<8x128xf32>
    %71 = math.exp %70 : vector<8x128xf32>
    %cst_26 = arith.constant 1.000000e+00 : f32
    %72 = vector.broadcast %cst_26 : f32 to vector<8x128xf32>
    %73 = arith.addf %72, %71 : vector<8x128xf32>
    %74 = arith.divf %72, %73 : vector<8x128xf32>
    %75 = vector.extract_strided_slice %68 {offsets = [0, 128], sizes = [8, 128], strides = [1, 1]} : vector<8x512xf32> to vector<8x128xf32>
    %76 = arith.negf %75 : vector<8x128xf32>
    %77 = math.exp %76 : vector<8x128xf32>
    %cst_27 = arith.constant 1.000000e+00 : f32
    %78 = vector.broadcast %cst_27 : f32 to vector<8x128xf32>
    %79 = arith.addf %78, %77 : vector<8x128xf32>
    %80 = arith.divf %78, %79 : vector<8x128xf32>
    %81 = vector.extract_strided_slice %68 {offsets = [0, 256], sizes = [8, 128], strides = [1, 1]} : vector<8x512xf32> to vector<8x128xf32>
    %82 = math.tanh %81 : vector<8x128xf32>
    %83 = vector.extract_strided_slice %68 {offsets = [0, 384], sizes = [8, 128], strides = [1, 1]} : vector<8x512xf32> to vector<8x128xf32>
    %84 = arith.negf %83 : vector<8x128xf32>
    %85 = math.exp %84 : vector<8x128xf32>
    %cst_28 = arith.constant 1.000000e+00 : f32
    %86 = vector.broadcast %cst_28 : f32 to vector<8x128xf32>
    %87 = arith.addf %86, %85 : vector<8x128xf32>
    %88 = arith.divf %86, %87 : vector<8x128xf32>
    %89 = arith.mulf %80, %59 : vector<8x128xf32>
    %90 = arith.mulf %74, %82 : vector<8x128xf32>
    %91 = arith.addf %89, %90 : vector<8x128xf32>
    %92 = math.tanh %91 : vector<8x128xf32>
    %93 = arith.mulf %88, %92 : vector<8x128xf32>
    %c2_i32 = arith.constant 2 : i32
    %94 = arith.index_cast %c2_i32 : i32 to index
    %c0_29 = arith.constant 0 : index
    %c0_30 = arith.constant 0 : index
    %95 = vector.load %arg7[%94, %c0_29, %c0_30] : memref<8x8x512xf32, #tpu.memory_space<vmem>>, vector<1x8x512xf32>
    %96 = vector.shape_cast %95 : vector<1x8x512xf32> to vector<8x512xf32>
    %97 = arith.truncf %93 : vector<8x128xf32> to vector<8x128xbf16>
    %c0_31 = arith.constant 0 : index
    %c0_32 = arith.constant 0 : index
    %98 = vector.load %arg2[%c0_31, %c0_32] : memref<128x512xbf16, #tpu.memory_space<vmem>>, vector<128x512xbf16>
    %cst_33 = arith.constant dense<0.000000e+00> : vector<8x512xf32>
    %99 = tpu.matmul %97, %98, %cst_33 {dimension_numbers = #tpu.dot_dimension_numbers<[1], [0], [0], [1], [0, 0, 1, 1], [], []>} : vector<8x128xbf16>, vector<128x512xbf16>, vector<8x512xf32> -> vector<8x512xf32>
    %100 = arith.addf %96, %99 : vector<8x512xf32>
    %101 = vector.extract_strided_slice %100 {offsets = [0, 0], sizes = [8, 128], strides = [1, 1]} : vector<8x512xf32> to vector<8x128xf32>
    %102 = arith.negf %101 : vector<8x128xf32>
    %103 = math.exp %102 : vector<8x128xf32>
    %cst_34 = arith.constant 1.000000e+00 : f32
    %104 = vector.broadcast %cst_34 : f32 to vector<8x128xf32>
    %105 = arith.addf %104, %103 : vector<8x128xf32>
    %106 = arith.divf %104, %105 : vector<8x128xf32>
    %107 = vector.extract_strided_slice %100 {offsets = [0, 128], sizes = [8, 128], strides = [1, 1]} : vector<8x512xf32> to vector<8x128xf32>
    %108 = arith.negf %107 : vector<8x128xf32>
    %109 = math.exp %108 : vector<8x128xf32>
    %cst_35 = arith.constant 1.000000e+00 : f32
    %110 = vector.broadcast %cst_35 : f32 to vector<8x128xf32>
    %111 = arith.addf %110, %109 : vector<8x128xf32>
    %112 = arith.divf %110, %111 : vector<8x128xf32>
    %113 = vector.extract_strided_slice %100 {offsets = [0, 256], sizes = [8, 128], strides = [1, 1]} : vector<8x512xf32> to vector<8x128xf32>
    %114 = math.tanh %113 : vector<8x128xf32>
    %115 = vector.extract_strided_slice %100 {offsets = [0, 384], sizes = [8, 128], strides = [1, 1]} : vector<8x512xf32> to vector<8x128xf32>
    %116 = arith.negf %115 : vector<8x128xf32>
    %117 = math.exp %116 : vector<8x128xf32>
    %cst_36 = arith.constant 1.000000e+00 : f32
    %118 = vector.broadcast %cst_36 : f32 to vector<8x128xf32>
    %119 = arith.addf %118, %117 : vector<8x128xf32>
    %120 = arith.divf %118, %119 : vector<8x128xf32>
    %121 = arith.mulf %112, %91 : vector<8x128xf32>
    %122 = arith.mulf %106, %114 : vector<8x128xf32>
    %123 = arith.addf %121, %122 : vector<8x128xf32>
    %124 = math.tanh %123 : vector<8x128xf32>
    %125 = arith.mulf %120, %124 : vector<8x128xf32>
    %c3_i32 = arith.constant 3 : i32
    %126 = arith.index_cast %c3_i32 : i32 to index
    %c0_37 = arith.constant 0 : index
    %c0_38 = arith.constant 0 : index
    %127 = vector.load %arg7[%126, %c0_37, %c0_38] : memref<8x8x512xf32, #tpu.memory_space<vmem>>, vector<1x8x512xf32>
    %128 = vector.shape_cast %127 : vector<1x8x512xf32> to vector<8x512xf32>
    %129 = arith.truncf %125 : vector<8x128xf32> to vector<8x128xbf16>
    %c0_39 = arith.constant 0 : index
    %c0_40 = arith.constant 0 : index
    %130 = vector.load %arg2[%c0_39, %c0_40] : memref<128x512xbf16, #tpu.memory_space<vmem>>, vector<128x512xbf16>
    %cst_41 = arith.constant dense<0.000000e+00> : vector<8x512xf32>
    %131 = tpu.matmul %129, %130, %cst_41 {dimension_numbers = #tpu.dot_dimension_numbers<[1], [0], [0], [1], [0, 0, 1, 1], [], []>} : vector<8x128xbf16>, vector<128x512xbf16>, vector<8x512xf32> -> vector<8x512xf32>
    %132 = arith.addf %128, %131 : vector<8x512xf32>
    %133 = vector.extract_strided_slice %132 {offsets = [0, 0], sizes = [8, 128], strides = [1, 1]} : vector<8x512xf32> to vector<8x128xf32>
    %134 = arith.negf %133 : vector<8x128xf32>
    %135 = math.exp %134 : vector<8x128xf32>
    %cst_42 = arith.constant 1.000000e+00 : f32
    %136 = vector.broadcast %cst_42 : f32 to vector<8x128xf32>
    %137 = arith.addf %136, %135 : vector<8x128xf32>
    %138 = arith.divf %136, %137 : vector<8x128xf32>
    %139 = vector.extract_strided_slice %132 {offsets = [0, 128], sizes = [8, 128], strides = [1, 1]} : vector<8x512xf32> to vector<8x128xf32>
    %140 = arith.negf %139 : vector<8x128xf32>
    %141 = math.exp %140 : vector<8x128xf32>
    %cst_43 = arith.constant 1.000000e+00 : f32
    %142 = vector.broadcast %cst_43 : f32 to vector<8x128xf32>
    %143 = arith.addf %142, %141 : vector<8x128xf32>
    %144 = arith.divf %142, %143 : vector<8x128xf32>
    %145 = vector.extract_strided_slice %132 {offsets = [0, 256], sizes = [8, 128], strides = [1, 1]} : vector<8x512xf32> to vector<8x128xf32>
    %146 = math.tanh %145 : vector<8x128xf32>
    %147 = vector.extract_strided_slice %132 {offsets = [0, 384], sizes = [8, 128], strides = [1, 1]} : vector<8x512xf32> to vector<8x128xf32>
    %148 = arith.negf %147 : vector<8x128xf32>
    %149 = math.exp %148 : vector<8x128xf32>
    %cst_44 = arith.constant 1.000000e+00 : f32
    %150 = vector.broadcast %cst_44 : f32 to vector<8x128xf32>
    %151 = arith.addf %150, %149 : vector<8x128xf32>
    %152 = arith.divf %150, %151 : vector<8x128xf32>
    %153 = arith.mulf %144, %123 : vector<8x128xf32>
    %154 = arith.mulf %138, %146 : vector<8x128xf32>
    %155 = arith.addf %153, %154 : vector<8x128xf32>
    %156 = math.tanh %155 : vector<8x128xf32>
    %157 = arith.mulf %152, %156 : vector<8x128xf32>
    %c4_i32 = arith.constant 4 : i32
    %158 = arith.index_cast %c4_i32 : i32 to index
    %c0_45 = arith.constant 0 : index
    %c0_46 = arith.constant 0 : index
    %159 = vector.load %arg7[%158, %c0_45, %c0_46] : memref<8x8x512xf32, #tpu.memory_space<vmem>>, vector<1x8x512xf32>
    %160 = vector.shape_cast %159 : vector<1x8x512xf32> to vector<8x512xf32>
    %161 = arith.truncf %157 : vector<8x128xf32> to vector<8x128xbf16>
    %c0_47 = arith.constant 0 : index
    %c0_48 = arith.constant 0 : index
    %162 = vector.load %arg2[%c0_47, %c0_48] : memref<128x512xbf16, #tpu.memory_space<vmem>>, vector<128x512xbf16>
    %cst_49 = arith.constant dense<0.000000e+00> : vector<8x512xf32>
    %163 = tpu.matmul %161, %162, %cst_49 {dimension_numbers = #tpu.dot_dimension_numbers<[1], [0], [0], [1], [0, 0, 1, 1], [], []>} : vector<8x128xbf16>, vector<128x512xbf16>, vector<8x512xf32> -> vector<8x512xf32>
    %164 = arith.addf %160, %163 : vector<8x512xf32>
    %165 = vector.extract_strided_slice %164 {offsets = [0, 0], sizes = [8, 128], strides = [1, 1]} : vector<8x512xf32> to vector<8x128xf32>
    %166 = arith.negf %165 : vector<8x128xf32>
    %167 = math.exp %166 : vector<8x128xf32>
    %cst_50 = arith.constant 1.000000e+00 : f32
    %168 = vector.broadcast %cst_50 : f32 to vector<8x128xf32>
    %169 = arith.addf %168, %167 : vector<8x128xf32>
    %170 = arith.divf %168, %169 : vector<8x128xf32>
    %171 = vector.extract_strided_slice %164 {offsets = [0, 128], sizes = [8, 128], strides = [1, 1]} : vector<8x512xf32> to vector<8x128xf32>
    %172 = arith.negf %171 : vector<8x128xf32>
    %173 = math.exp %172 : vector<8x128xf32>
    %cst_51 = arith.constant 1.000000e+00 : f32
    %174 = vector.broadcast %cst_51 : f32 to vector<8x128xf32>
    %175 = arith.addf %174, %173 : vector<8x128xf32>
    %176 = arith.divf %174, %175 : vector<8x128xf32>
    %177 = vector.extract_strided_slice %164 {offsets = [0, 256], sizes = [8, 128], strides = [1, 1]} : vector<8x512xf32> to vector<8x128xf32>
    %178 = math.tanh %177 : vector<8x128xf32>
    %179 = vector.extract_strided_slice %164 {offsets = [0, 384], sizes = [8, 128], strides = [1, 1]} : vector<8x512xf32> to vector<8x128xf32>
    %180 = arith.negf %179 : vector<8x128xf32>
    %181 = math.exp %180 : vector<8x128xf32>
    %cst_52 = arith.constant 1.000000e+00 : f32
    %182 = vector.broadcast %cst_52 : f32 to vector<8x128xf32>
    %183 = arith.addf %182, %181 : vector<8x128xf32>
    %184 = arith.divf %182, %183 : vector<8x128xf32>
    %185 = arith.mulf %176, %155 : vector<8x128xf32>
    %186 = arith.mulf %170, %178 : vector<8x128xf32>
    %187 = arith.addf %185, %186 : vector<8x128xf32>
    %188 = math.tanh %187 : vector<8x128xf32>
    %189 = arith.mulf %184, %188 : vector<8x128xf32>
    %c5_i32 = arith.constant 5 : i32
    %190 = arith.index_cast %c5_i32 : i32 to index
    %c0_53 = arith.constant 0 : index
    %c0_54 = arith.constant 0 : index
    %191 = vector.load %arg7[%190, %c0_53, %c0_54] : memref<8x8x512xf32, #tpu.memory_space<vmem>>, vector<1x8x512xf32>
    %192 = vector.shape_cast %191 : vector<1x8x512xf32> to vector<8x512xf32>
    %193 = arith.truncf %189 : vector<8x128xf32> to vector<8x128xbf16>
    %c0_55 = arith.constant 0 : index
    %c0_56 = arith.constant 0 : index
    %194 = vector.load %arg2[%c0_55, %c0_56] : memref<128x512xbf16, #tpu.memory_space<vmem>>, vector<128x512xbf16>
    %cst_57 = arith.constant dense<0.000000e+00> : vector<8x512xf32>
    %195 = tpu.matmul %193, %194, %cst_57 {dimension_numbers = #tpu.dot_dimension_numbers<[1], [0], [0], [1], [0, 0, 1, 1], [], []>} : vector<8x128xbf16>, vector<128x512xbf16>, vector<8x512xf32> -> vector<8x512xf32>
    %196 = arith.addf %192, %195 : vector<8x512xf32>
    %197 = vector.extract_strided_slice %196 {offsets = [0, 0], sizes = [8, 128], strides = [1, 1]} : vector<8x512xf32> to vector<8x128xf32>
    %198 = arith.negf %197 : vector<8x128xf32>
    %199 = math.exp %198 : vector<8x128xf32>
    %cst_58 = arith.constant 1.000000e+00 : f32
    %200 = vector.broadcast %cst_58 : f32 to vector<8x128xf32>
    %201 = arith.addf %200, %199 : vector<8x128xf32>
    %202 = arith.divf %200, %201 : vector<8x128xf32>
    %203 = vector.extract_strided_slice %196 {offsets = [0, 128], sizes = [8, 128], strides = [1, 1]} : vector<8x512xf32> to vector<8x128xf32>
    %204 = arith.negf %203 : vector<8x128xf32>
    %205 = math.exp %204 : vector<8x128xf32>
    %cst_59 = arith.constant 1.000000e+00 : f32
    %206 = vector.broadcast %cst_59 : f32 to vector<8x128xf32>
    %207 = arith.addf %206, %205 : vector<8x128xf32>
    %208 = arith.divf %206, %207 : vector<8x128xf32>
    %209 = vector.extract_strided_slice %196 {offsets = [0, 256], sizes = [8, 128], strides = [1, 1]} : vector<8x512xf32> to vector<8x128xf32>
    %210 = math.tanh %209 : vector<8x128xf32>
    %211 = vector.extract_strided_slice %196 {offsets = [0, 384], sizes = [8, 128], strides = [1, 1]} : vector<8x512xf32> to vector<8x128xf32>
    %212 = arith.negf %211 : vector<8x128xf32>
    %213 = math.exp %212 : vector<8x128xf32>
    %cst_60 = arith.constant 1.000000e+00 : f32
    %214 = vector.broadcast %cst_60 : f32 to vector<8x128xf32>
    %215 = arith.addf %214, %213 : vector<8x128xf32>
    %216 = arith.divf %214, %215 : vector<8x128xf32>
    %217 = arith.mulf %208, %187 : vector<8x128xf32>
    %218 = arith.mulf %202, %210 : vector<8x128xf32>
    %219 = arith.addf %217, %218 : vector<8x128xf32>
    %220 = math.tanh %219 : vector<8x128xf32>
    %221 = arith.mulf %216, %220 : vector<8x128xf32>
    %c6_i32 = arith.constant 6 : i32
    %222 = arith.index_cast %c6_i32 : i32 to index
    %c0_61 = arith.constant 0 : index
    %c0_62 = arith.constant 0 : index
    %223 = vector.load %arg7[%222, %c0_61, %c0_62] : memref<8x8x512xf32, #tpu.memory_space<vmem>>, vector<1x8x512xf32>
    %224 = vector.shape_cast %223 : vector<1x8x512xf32> to vector<8x512xf32>
    %225 = arith.truncf %221 : vector<8x128xf32> to vector<8x128xbf16>
    %c0_63 = arith.constant 0 : index
    %c0_64 = arith.constant 0 : index
    %226 = vector.load %arg2[%c0_63, %c0_64] : memref<128x512xbf16, #tpu.memory_space<vmem>>, vector<128x512xbf16>
    %cst_65 = arith.constant dense<0.000000e+00> : vector<8x512xf32>
    %227 = tpu.matmul %225, %226, %cst_65 {dimension_numbers = #tpu.dot_dimension_numbers<[1], [0], [0], [1], [0, 0, 1, 1], [], []>} : vector<8x128xbf16>, vector<128x512xbf16>, vector<8x512xf32> -> vector<8x512xf32>
    %228 = arith.addf %224, %227 : vector<8x512xf32>
    %229 = vector.extract_strided_slice %228 {offsets = [0, 0], sizes = [8, 128], strides = [1, 1]} : vector<8x512xf32> to vector<8x128xf32>
    %230 = arith.negf %229 : vector<8x128xf32>
    %231 = math.exp %230 : vector<8x128xf32>
    %cst_66 = arith.constant 1.000000e+00 : f32
    %232 = vector.broadcast %cst_66 : f32 to vector<8x128xf32>
    %233 = arith.addf %232, %231 : vector<8x128xf32>
    %234 = arith.divf %232, %233 : vector<8x128xf32>
    %235 = vector.extract_strided_slice %228 {offsets = [0, 128], sizes = [8, 128], strides = [1, 1]} : vector<8x512xf32> to vector<8x128xf32>
    %236 = arith.negf %235 : vector<8x128xf32>
    %237 = math.exp %236 : vector<8x128xf32>
    %cst_67 = arith.constant 1.000000e+00 : f32
    %238 = vector.broadcast %cst_67 : f32 to vector<8x128xf32>
    %239 = arith.addf %238, %237 : vector<8x128xf32>
    %240 = arith.divf %238, %239 : vector<8x128xf32>
    %241 = vector.extract_strided_slice %228 {offsets = [0, 256], sizes = [8, 128], strides = [1, 1]} : vector<8x512xf32> to vector<8x128xf32>
    %242 = math.tanh %241 : vector<8x128xf32>
    %243 = vector.extract_strided_slice %228 {offsets = [0, 384], sizes = [8, 128], strides = [1, 1]} : vector<8x512xf32> to vector<8x128xf32>
    %244 = arith.negf %243 : vector<8x128xf32>
    %245 = math.exp %244 : vector<8x128xf32>
    %cst_68 = arith.constant 1.000000e+00 : f32
    %246 = vector.broadcast %cst_68 : f32 to vector<8x128xf32>
    %247 = arith.addf %246, %245 : vector<8x128xf32>
    %248 = arith.divf %246, %247 : vector<8x128xf32>
    %249 = arith.mulf %240, %219 : vector<8x128xf32>
    %250 = arith.mulf %234, %242 : vector<8x128xf32>
    %251 = arith.addf %249, %250 : vector<8x128xf32>
    %252 = math.tanh %251 : vector<8x128xf32>
    %253 = arith.mulf %248, %252 : vector<8x128xf32>
    %c7_i32 = arith.constant 7 : i32
    %254 = arith.index_cast %c7_i32 : i32 to index
    %c0_69 = arith.constant 0 : index
    %c0_70 = arith.constant 0 : index
    %255 = vector.load %arg7[%254, %c0_69, %c0_70] : memref<8x8x512xf32, #tpu.memory_space<vmem>>, vector<1x8x512xf32>
    %256 = vector.shape_cast %255 : vector<1x8x512xf32> to vector<8x512xf32>
    %257 = arith.truncf %253 : vector<8x128xf32> to vector<8x128xbf16>
    %c0_71 = arith.constant 0 : index
    %c0_72 = arith.constant 0 : index
    %258 = vector.load %arg2[%c0_71, %c0_72] : memref<128x512xbf16, #tpu.memory_space<vmem>>, vector<128x512xbf16>
    %cst_73 = arith.constant dense<0.000000e+00> : vector<8x512xf32>
    %259 = tpu.matmul %257, %258, %cst_73 {dimension_numbers = #tpu.dot_dimension_numbers<[1], [0], [0], [1], [0, 0, 1, 1], [], []>} : vector<8x128xbf16>, vector<128x512xbf16>, vector<8x512xf32> -> vector<8x512xf32>
    %260 = arith.addf %256, %259 : vector<8x512xf32>
    %261 = vector.extract_strided_slice %260 {offsets = [0, 0], sizes = [8, 128], strides = [1, 1]} : vector<8x512xf32> to vector<8x128xf32>
    %262 = arith.negf %261 : vector<8x128xf32>
    %263 = math.exp %262 : vector<8x128xf32>
    %cst_74 = arith.constant 1.000000e+00 : f32
    %264 = vector.broadcast %cst_74 : f32 to vector<8x128xf32>
    %265 = arith.addf %264, %263 : vector<8x128xf32>
    %266 = arith.divf %264, %265 : vector<8x128xf32>
    %267 = vector.extract_strided_slice %260 {offsets = [0, 128], sizes = [8, 128], strides = [1, 1]} : vector<8x512xf32> to vector<8x128xf32>
    %268 = arith.negf %267 : vector<8x128xf32>
    %269 = math.exp %268 : vector<8x128xf32>
    %cst_75 = arith.constant 1.000000e+00 : f32
    %270 = vector.broadcast %cst_75 : f32 to vector<8x128xf32>
    %271 = arith.addf %270, %269 : vector<8x128xf32>
    %272 = arith.divf %270, %271 : vector<8x128xf32>
    %273 = vector.extract_strided_slice %260 {offsets = [0, 256], sizes = [8, 128], strides = [1, 1]} : vector<8x512xf32> to vector<8x128xf32>
    %274 = math.tanh %273 : vector<8x128xf32>
    %275 = vector.extract_strided_slice %260 {offsets = [0, 384], sizes = [8, 128], strides = [1, 1]} : vector<8x512xf32> to vector<8x128xf32>
    %276 = arith.negf %275 : vector<8x128xf32>
    %277 = math.exp %276 : vector<8x128xf32>
    %cst_76 = arith.constant 1.000000e+00 : f32
    %278 = vector.broadcast %cst_76 : f32 to vector<8x128xf32>
    %279 = arith.addf %278, %277 : vector<8x128xf32>
    %280 = arith.divf %278, %279 : vector<8x128xf32>
    %281 = arith.mulf %272, %251 : vector<8x128xf32>
    %282 = arith.mulf %266, %274 : vector<8x128xf32>
    %283 = arith.addf %281, %282 : vector<8x128xf32>
    %284 = math.tanh %283 : vector<8x128xf32>
    %285 = arith.mulf %280, %284 : vector<8x128xf32>
    %c8_i32 = arith.constant 8 : i32
    %c0_77 = arith.constant 0 : index
    %c0_78 = arith.constant 0 : index
    %286 = vector.load %arg4[%c0_77, %c0_78] : memref<1x128xf32, #tpu.memory_space<vmem>>, vector<1x128xf32>
    %287 = vector.broadcast %286 : vector<1x128xf32> to vector<8x128xf32>
    %288 = arith.mulf %285, %287 : vector<8x128xf32>
    %cst_79 = arith.constant dense<0.000000e+00> : vector<8xf32>
    %289 = vector.multi_reduction <add>, %288, %cst_79 [1] : vector<8x128xf32> to vector<8xf32>
    %290 = vector.shape_cast %289 : vector<8xf32> to vector<8x1xf32>
    %c0_80 = arith.constant 0 : index
    %c0_81 = arith.constant 0 : index
    %291 = vector.load %arg5[%c0_80, %c0_81] : memref<1x1xf32, #tpu.memory_space<vmem>>, vector<1x1xf32>
    %292 = vector.broadcast %291 : vector<1x1xf32> to vector<8x1xf32>
    %293 = arith.addf %290, %292 : vector<8x1xf32>
    %c0_82 = arith.constant 0 : index
    %c0_83 = arith.constant 0 : index
    %294 = vector.load %arg6[%c0_82, %c0_83] : memref<8x1xf32, #tpu.memory_space<vmem>>, vector<8x1xf32>
    tpu.vector_store %arg6[%c0_82, %c0_83], %293 {strides = array<i32>} : memref<8x1xf32, #tpu.memory_space<vmem>>, vector<8x1xf32>,
    return
  }
}

</mosaic_0001>

<bundles_post_ra>
// kernel: tpu_custom_call.1
= control target key start
LH: loop header
LB: loop body
LE: loop exit
PB: predicated region body
PF: predicated region fallthrough
CT: control target
= control target key end

     0   :  { %s2639_s0 = inlined_call_operand.vmem [shape: f32[8,8,3], index: 0, kind: input, shape index: {}]   ;;  %s2640_s1 = inlined_call_operand.vmem [shape: f32[3,512], index: 1, kind: input, shape index: {}]   ;;  %s2641_s2 = inlined_call_operand.hbm [shape: bf16[128,512], index: 2, kind: input, shape index: {}]   ;;  %s2642_s3 = inlined_call_operand.vmem [shape: f32[1,512], index: 3, kind: input, shape index: {}]   ;;  %s2643_s4 = inlined_call_operand.vmem [shape: f32[1,128], index: 4, kind: input, shape index: {}]   ;;  %s2644_s5 = inlined_call_operand.<no memory space> [shape: f32[1,1], index: 5, kind: input, shape index: {}]   ;;  %s2645_s6 = inlined_call_operand.vmem [shape: f32[8,1], index: 6, kind: output, shape index: {}]  }
   0x1   :  { %v11_v0 = vstv %s2644_s5 }
   0x2   :  { %12 = vst [vmem:[#allocation3] sm:$0x1] %v11_v0 }
   0x3   :  { %13 = vsyncpa [#allocation5], 0  ;;  %s1931_s23 = smov [#allocation4]   ;;  %s1907_s27 = scalar_lea.hbm %s2641_s2, 4096 }
   0x4   :  { %s23_s24 = sshll.u32 %s1931_s23, 4  ;;  %p1908_p0 = scmp.ne.s32.totalorder %s2641_s2, %s1907_s27  ;;  %s24_s24 = int_to_ptr.vmem [resolvable:$true] %s23_s24 }
   0x5   :  { %p1911_p1 = scmp.lt.u32.totalorder %s1907_s27, %s2641_s2 }
   0x7   :  { %p1913_p2 = pnand %p1911_p1, %p1908_p0 }
   0x9   :  { %1916 = shalt.err (!%p1913_p2)
}
   0xa   :  { %s1917_s5 = scalar_lea.vmem %s24_s24, 4096  ;;  %p1922_p4 = scmp.lt.s32.totalorder %s24_s24, %s24_s24 }
   0xb   :  { %p1918_p3 = scmp.ne.s32.totalorder %s24_s24, %s1917_s5  ;;  %p1923_p5 = scmp.lt.s32.totalorder %s1917_s5, %s1917_s5 }
   0xd   :  { %p1924_p6 = por %p1923_p5, %p1922_p4 }
   0xf   :  { %p1925_p7 = pnand %p1924_p6, %p1918_p3 }
  0x11   :  { %1928 = shalt.err (!%p1925_p7)
}
  0x12   :  { %s1932_s8 = smov 256   ;;  %s1933_s9 = smov 16  }
  0x13   :  { %29 = dma.hbm_to_vmem [thread:$0]  %s2641_s2, 4096, %s24_s24, [#allocation5], %s1932_s8, %s1932_s8, %s1933_s9  }
  0x14   :  { %1929 = dma.done.wait [#allocation5], 4096  }
  0x15   :  { %1930 = vsyncadd [#allocation5], 4294963200  ;;  %v2650_v1 = vmov 0   ;;  %v2648_v2 = vmov 2   ;;  %v1991_v3 = vld [vmem:[#allocation4 + $0x4] ss:$16 sps:$4 sm:$0xff]   ;;  %v50_v39 = vlaneseq }
  0x16   :  { %698 = vmatprep.mubr.bf16.mxu0 %v2650_v1  ;;  %739 = vmatprep.mubr.bf16.mxu1 %v2650_v1  ;;  %2691 = vst [vmem:[#allocation7_spill] sm:$0xff] %v1991_v3  ;;  %v1993_v4 = vld [vmem:[#allocation4 + $0xc] ss:$16 sps:$4 sm:$0xff]   ;;  %v1996_v5 = vld [vmem:[#allocation4] ss:$16 sps:$4 sm:$0xff]   ;;  %v2646_v34 = vmov 1  }
  0x17   :  { %1679 = vset.pattern.permute.xlu0 %v2650_v1  ;;  %1681 = vset.pattern.permute.xlu1 %v2648_v2  ;;  %2692 = vst [vmem:[#allocation8_spill] sm:$0xff] %v1993_v4  ;;  %v1998_v6 = vld [vmem:[#allocation4 + $0x8] ss:$16 sps:$4 sm:$0xff]   ;;  %v2001_v7 = vld [vmem:[#allocation4 + $0x24] ss:$16 sps:$4 sm:$0xff]   ;;  %v51_v40 = vshrl.u32 %v50_v39, 7 }
  0x18   :  { %666 = vmatprep.subr.bf16.mxu0 %v1991_v3  ;;  %707 = vmatprep.subr.bf16.mxu1 %v1993_v4  ;;  %v2005_v8 = vld [vmem:[#allocation4 + $0x2c] ss:$16 sps:$4 sm:$0xff]   ;;  %v2007_v9 = vld [vmem:[#allocation4 + $0x20] ss:$16 sps:$4 sm:$0xff]   ;;  %v2010_v10 = vld [vmem:[#allocation4 + $0x28] ss:$16 sps:$4 sm:$0xff]  }
  0x19   :  { %667 = vmatpush1.bf16.msra.mxu0 %v1996_v5  ;;  %708 = vmatpush1.bf16.msra.mxu1 %v1998_v6  ;;  %v2013_v11 = vld [vmem:[#allocation4 + $0x44] ss:$16 sps:$4 sm:$0xff]   ;;  %v2015_v12 = vld [vmem:[#allocation4 + $0x4c] ss:$16 sps:$4 sm:$0xff]   ;;  %v2017_v13 = vld [vmem:[#allocation4 + $0x40] ss:$16 sps:$4 sm:$0xff]  }
  0x1a   :  { %668 = vmatprep.subr.bf16.mxu0 %v2001_v7  ;;  %709 = vmatprep.subr.bf16.mxu1 %v2005_v8  ;;  %v2019_v14 = vld [vmem:[#allocation4 + $0x48] ss:$16 sps:$4 sm:$0xff]   ;;  %v2023_v15 = vld [vmem:[#allocation4 + $0x64] ss:$16 sps:$4 sm:$0xff]   ;;  %v2027_v16 = vld [vmem:[#allocation4 + $0x6c] ss:$16 sps:$4 sm:$0xff]  }
  0x1b   :  { %v2029_v17 = vld [vmem:[#allocation4 + $0x60] ss:$16 sps:$4 sm:$0xff]   ;;  %v2033_v18 = vld [vmem:[#allocation4 + $0x68] ss:$16 sps:$4 sm:$0xff]   ;;  %v2035_v19 = vld [vmem:[#allocation4 + $0x84] ss:$16 sps:$4 sm:$0xff]  }
  0x1c   :  { %v2039_v20 = vld [vmem:[#allocation4 + $0x8c] ss:$16 sps:$4 sm:$0xff]   ;;  %v2041_v21 = vld [vmem:[#allocation4 + $0x80] ss:$16 sps:$4 sm:$0xff]   ;;  %v2043_v22 = vld [vmem:[#allocation4 + $0x88] ss:$16 sps:$4 sm:$0xff]  }
  0x1d   :  { %669 = vmatpush1.bf16.msra.mxu0 %v2007_v9  ;;  %710 = vmatpush1.bf16.msra.mxu1 %v2010_v10  ;;  %v2047_v23 = vld [vmem:[#allocation4 + $0xa4] ss:$16 sps:$4 sm:$0xff]   ;;  %v2051_v24 = vld [vmem:[#allocation4 + $0xac] ss:$16 sps:$4 sm:$0xff]   ;;  %v2055_v25 = vld [vmem:[#allocation4 + $0xa0] ss:$16 sps:$4 sm:$0xff]  }
  0x1e   :  { %670 = vmatprep.subr.bf16.mxu0 %v2013_v11  ;;  %711 = vmatprep.subr.bf16.mxu1 %v2015_v12  ;;  %v2057_v26 = vld [vmem:[#allocation4 + $0xa8] ss:$16 sps:$4 sm:$0xff]   ;;  %v2061_v27 = vld [vmem:[#allocation4 + $0xc4] ss:$16 sps:$4 sm:$0xff]   ;;  %v2063_v28 = vld [vmem:[#allocation4 + $0xcc] ss:$16 sps:$4 sm:$0xff]  }
  0x1f   :  { %v40_v29 = vld [vmem:[%s2639_s0] sm:$0xff]  ;;  %v2072_v31 = vld [vmem:[#allocation4 + $0xc8] ss:$16 sps:$4 sm:$0xff]   ;;  %v42_v38 = vld [vmem:[%s2639_s0 + $0x10] sm:$0xff]  ;;  %v52_v41 = vsub.s32 0, %v51_v40  ;;  %v56_v42 = vsub.s32 1, %v51_v40 }
  0x20   :  { %77 = vperm.xlu0 %1679, %v40_v29   ;;  %322 = vperm.xlu1 %1681, %v40_v29   ;;  %v2070_v30 = vld [vmem:[#allocation4 + $0xc0] ss:$16 sps:$4 sm:$0xff]   ;;  %v2076_v32 = vld [vmem:[#allocation4 + $0xe4] ss:$16 sps:$4 sm:$0xff]   ;;  %v2078_v33 = vld [vmem:[#allocation4 + $0xec] ss:$16 sps:$4 sm:$0xff]  }
  0x21   :  { %671 = vmatpush1.bf16.msra.mxu0 %v2017_v13  ;;  %712 = vmatpush1.bf16.msra.mxu1 %v2019_v14  ;;  %v2084_v35 = vld [vmem:[#allocation4 + $0xe0] ss:$16 sps:$4 sm:$0xff]   ;;  %v2086_v36 = vld [vmem:[#allocation4 + $0xe8] ss:$16 sps:$4 sm:$0xff]   ;;  %v64_v49 = vsub.s32 3, %v51_v40  ;;  %v60_v59 = vsub.s32 2, %v51_v40 }
  0x22   :  { %672 = vmatprep.subr.bf16.mxu0 %v2023_v15  ;;  %713 = vmatprep.subr.bf16.mxu1 %v2027_v16  ;;  %v41_v37 = vld [vmem:[%s2639_s0 + $0x8] sm:$0xff]  ;;  %v48_v48 = vld [vmem:[%s2642_s3] sm:$0xf]  ;;  %vm1606_vm0 = vcmask 7168  }
  0x23   :  { %v74_v43 = vld [vmem:[%s2640_s1] ss:$4 sm:$0xf]  ;;  %v1613_v47 = vld [vmem:[%s2640_s1 + $0x1] ss:$4 sm:$0xf]  ;;  %v2158_v52 = vrot.slane %v48_v48, %v52_v41  ;;  %v2166_v57 = vrot.slane %v48_v48, %v56_v42 }
  0x24   :  { %1680 = vset.pattern.permute.xlu0 %v2646_v34  ;;  %1682 = vset.pattern.permute.xlu1 %v2650_v1  ;;  %v2145_v45 = vrot.slane %v74_v43, %v52_v41  ;;  %v2147_v46 = vrot.slane %v74_v43, %v56_v42  ;;  %v2156_v51 = vrot.slane %v1613_v47, %v52_v41  ;;  %v1614_v56 = vld [vmem:[%s2640_s1 + $0x2] ss:$4 sm:$0xf] }
  0x25   :  { %673 = vmatpush1.bf16.msra.mxu0 %v2029_v17  ;;  %714 = vmatpush1.bf16.msra.mxu1 %v2033_v18  ;;  %2696 = vst [vmem:[#allocation12_spill] sm:$0xff] %v2158_v52  ;;  %v2161_v54 = vrot.slane %v1613_v47, %v56_v42  ;;  %2698 = vst [vmem:[#allocation14_spill] sm:$0xff] %v2166_v57  ;;  %v2168_v58 = vrot.slane %v74_v43, %v64_v49 }
  0x26   :  { %674 = vmatprep.subr.bf16.mxu0 %v2035_v19  ;;  %715 = vmatprep.subr.bf16.mxu1 %v2039_v20  ;;  %2693 = vst [vmem:[#allocation9_spill] sm:$0xff] %v2145_v45  ;;  %2694 = vst [vmem:[#allocation10_spill] sm:$0xff] %v2147_v46  ;;  %v2172_v62 = vrot.slane %v1614_v56, %v52_v41  ;;  %v2179_v39 = vrot.slane %v1613_v47, %v64_v49 }
  0x27   :  { %203 = vperm.xlu0 %1680, %v40_v29   ;;  %82 = vperm.xlu1 %1682, %v41_v37   ;;  %2695 = vst [vmem:[#allocation11_spill] sm:$0xff] %v2156_v51  ;;  %2697 = vst [vmem:[#allocation13_spill] sm:$0xff] %v2161_v54  ;;  %v2183_v40 = vrot.slane %v74_v43, %v60_v59 }
  0x28   :  { %2699 = vst [vmem:[#allocation15_spill] sm:$0xff] %v2168_v58  ;;  %2700 = vst [vmem:[#allocation16_spill] sm:$0xff] %v2172_v62 }
  0x29   :  { %675 = vmatpush1.bf16.msra.mxu0 %v2041_v21  ;;  %716 = vmatpush1.bf16.msra.mxu1 %v2043_v22  ;;  %2702 = vst [vmem:[#allocation18_spill] sm:$0xff] %v2179_v39  ;;  %2704 = vst [vmem:[#allocation20_spill] sm:$0xff] %v2183_v40 }
  0x2a   :  { %676 = vmatprep.subr.bf16.mxu0 %v2047_v23  ;;  %717 = vmatprep.subr.bf16.mxu1 %v2051_v24 }
  0x2b   :  { %1684 = vset.pattern.permute.xlu0 %v2648_v2  ;;  %1683 = vset.pattern.permute.xlu1 %v2646_v34 }
  0x2c   :  { %326 = vperm.xlu0 %1684, %v41_v37   ;;  %207 = vperm.xlu1 %1683, %v41_v37   ;;  %v2176_v37 = vrot.slane %v1614_v56, %v56_v42  ;;  %v2189_v42 = vrot.slane %v1614_v56, %v64_v49 }
  0x2d   :  { %677 = vmatpush1.bf16.msra.mxu0 %v2055_v25  ;;  %718 = vmatpush1.bf16.msra.mxu1 %v2057_v26 }
  0x2e   :  { %678 = vmatprep.subr.bf16.mxu0 %v2061_v27  ;;  %719 = vmatprep.subr.bf16.mxu1 %v2063_v28  ;;  %2701 = vst [vmem:[#allocation17_spill] sm:$0xff] %v2176_v37 }
  0x30   :  { %330 = vperm.xlu0 %1684, %v42_v38   ;;  %1685 = vset.pattern.permute.xlu1 %v2650_v1 }
  0x31   :  { %679 = vmatpush1.bf16.msra.mxu0 %v2070_v30  ;;  %720 = vmatpush1.bf16.msra.mxu1 %v2072_v31 }
  0x32   :  { %680 = vmatprep.subr.bf16.mxu0 %v2076_v32  ;;  %721 = vmatprep.subr.bf16.mxu1 %v2078_v33 }
  0x33   :  { %87 = vperm.xlu1 %1685, %v42_v38  }
  0x34   :  { %1688 = vset.pattern.permute.xlu0 %v2646_v34 }
  0x35   :  { %681 = vmatpush1.bf16.msra.mxu0 %v2084_v35  ;;  %722 = vmatpush1.bf16.msra.mxu1 %v2086_v36 }
  0x36   :  { %782 = vmatprep.subr.bf16.mxu0 %v1991_v3  ;;  %823 = vmatprep.subr.bf16.mxu1 %v1993_v4 }
  0x37   :  { %1686 = vset.pattern.permute.xlu1 %v2646_v34  ;;  %v2181_v34 = vrot.slane %v48_v48, %v64_v49 }
  0x38   :  { %699 = vmatmul.mubr.bf16.vlgmr.msra.gmra.mrb[0].mxu0 %v2650_v1  ;;  %740 = vmatmul.mubr.bf16.vlgmr.msra.gmra.mrb[0].mxu1 %v2650_v1 }
  0x39   :  { %783 = vmatpush1.bf16.msra.mxu0 %v1996_v5  ;;  %824 = vmatpush1.bf16.msra.mxu1 %v1998_v6  ;;  %2703 = vst [vmem:[#allocation19_spill] sm:$0xff] %v2181_v34 }
  0x3a   :  { %784 = vmatprep.subr.bf16.mxu0 %v2001_v7  ;;  %825 = vmatprep.subr.bf16.mxu1 %v2005_v8 }
  0x3b   :  { %814 = vmatprep.mubr.bf16.mxu0 %v2650_v1  ;;  %855 = vmatprep.mubr.bf16.mxu1 %v2650_v1 }
  0x3c   :  { %211 = vperm.xlu1 %1686, %v42_v38  }
  0x3d   :  { %785 = vmatpush1.bf16.msra.mxu0 %v2007_v9  ;;  %826 = vmatpush1.bf16.msra.mxu1 %v2010_v10 }
  0x3e   :  { %786 = vmatprep.subr.bf16.mxu0 %v2013_v11  ;;  %827 = vmatprep.subr.bf16.mxu1 %v2015_v12 }
  0x40   :  { %1687 = vset.pattern.permute.xlu1 %v2650_v1 }
  0x41   :  { %787 = vmatpush1.bf16.msra.mxu0 %v2017_v13  ;;  %828 = vmatpush1.bf16.msra.mxu1 %v2019_v14 }
  0x42   :  { %788 = vmatprep.subr.bf16.mxu0 %v2023_v15  ;;  %829 = vmatprep.subr.bf16.mxu1 %v2027_v16 }
  0x45   :  { %789 = vmatpush1.bf16.msra.mxu0 %v2029_v17  ;;  %830 = vmatpush1.bf16.msra.mxu1 %v2033_v18 }
  0x46   :  { %790 = vmatprep.subr.bf16.mxu0 %v2035_v19  ;;  %831 = vmatprep.subr.bf16.mxu1 %v2039_v20 }
  0x49   :  { %791 = vmatpush1.bf16.msra.mxu0 %v2041_v21  ;;  %832 = vmatpush1.bf16.msra.mxu1 %v2043_v22 }
  0x4a   :  { %792 = vmatprep.subr.bf16.mxu0 %v2047_v23  ;;  %833 = vmatprep.subr.bf16.mxu1 %v2051_v24 }
  0x4d   :  { %793 = vmatpush1.bf16.msra.mxu0 %v2055_v25  ;;  %834 = vmatpush1.bf16.msra.mxu1 %v2057_v26 }
  0x4e   :  { %794 = vmatprep.subr.bf16.mxu0 %v2061_v27  ;;  %835 = vmatprep.subr.bf16.mxu1 %v2063_v28 }
  0x51   :  { %795 = vmatpush1.bf16.msra.mxu0 %v2070_v30  ;;  %836 = vmatpush1.bf16.msra.mxu1 %v2072_v31 }
  0x52   :  { %796 = vmatprep.subr.bf16.mxu0 %v2076_v32  ;;  %837 = vmatprep.subr.bf16.mxu1 %v2078_v33 }
  0x55   :  { %797 = vmatpush1.bf16.msra.mxu0 %v2084_v35  ;;  %838 = vmatpush1.bf16.msra.mxu1 %v2086_v36 }
  0x56   :  { %898 = vmatprep.subr.bf16.mxu0 %v1991_v3  ;;  %939 = vmatprep.subr.bf16.mxu1 %v1993_v4 }
  0x9f   :  { %v78_v44 = vpop.permute.xlu0 %77  ;;  %v323_v0 = vpop.permute.xlu1 %322 }
  0xa0   :  { %v136_v50 = vmul.f32 %v2145_v45, %v78_v44  ;;  %v137_v53 = vmul.f32 %v2147_v46, %v78_v44  ;;  %v139_v38 = vmul.f32 %v2168_v58, %v78_v44  ;;  %v375_v1 = vmul.f32 %v2176_v37, %v323_v0 }
  0xa1   :  { %v138_v58 = vmul.f32 %v2183_v40, %v78_v44 }
  0xa2   :  { %v168_v61 = vadd.f32 %v136_v50, %v2158_v52  ;;  %v169_v29 = vadd.f32 %v137_v53, %v2166_v57  ;;  %v374_v50 = vmul.f32 %v2172_v62, %v323_v0  ;;  %v171_v53 = vadd.f32 %v139_v38, %v2181_v34 }
  0xa3   :  { %v2192_v57 = vrot.slane %v1613_v47, %v60_v59 }
  0xa6   :  { %v204_v55 = vpop.permute.xlu0 %203 }
  0xa7   :  { %v255_v60 = vmul.f32 %v2156_v51, %v204_v55  ;;  %v256_v63 = vmul.f32 %v2161_v54, %v204_v55  ;;  %v258_v54 = vmul.f32 %v2179_v39, %v204_v55  ;;  %v2194_v51 = vrot.slane %v48_v48, %v60_v59 }
  0xa8   :  { %v377_v39 = vmul.f32 %v2189_v42, %v323_v0  ;;  %v257_v34 = vmul.f32 %v2192_v57, %v204_v55 }
  0xa9   :  { %v287_v2 = vadd.f32 %v255_v60, %v168_v61  ;;  %v288_v41 = vadd.f32 %v256_v63, %v169_v29  ;;  %v290_v46 = vadd.f32 %v258_v54, %v171_v53  ;;  %v170_v47 = vadd.f32 %v138_v58, %v2194_v51 }
  0xab   :  { %v406_v52 = vadd.f32 %v374_v50, %v287_v2  ;;  %v407_v61 = vadd.f32 %v375_v1, %v288_v41  ;;  %v2199_v2 = vrot.slane %v1614_v56, %v60_v59  ;;  %v409_v1 = vadd.f32 %v377_v39, %v290_v46 }
  0xad   :  { %v376_v54 = vmul.f32 %v2199_v2, %v323_v0 }
 0x10b   :  { %v700_v43 = vpop.f32.mrb[0].mxu0  ;;  %v741_v60 = vpop.f32.mrb[0].mxu1 }
 0x10c   :  { %v748_v62 = vadd.f32 %v700_v43, %v406_v52  ;;  %v702_v63 = vpop.f32.mrb[1].mxu0  ;;  %v743_v29 = vpop.f32.mrb[1].mxu1  ;;  %v289_v52 = vadd.f32 %v257_v34, %v170_v47 }
 0x10d   :  { %v749_v37 = vadd.f32 %v702_v63, %v407_v61  ;;  %v704_v38 = vpop.f32.mrb[2].mxu0  ;;  %v745_v49 = vpop.f32.mrb[2].mxu1  ;;  %v751_v41 = vadd.f32 %v743_v29, %v409_v1 }
 0x10e   :  { %v1647_v44 = vmul.f32 -1.442695, %v748_v62  ;;  %v705_v48 = vpop.f32.mrb[3].mxu0  ;;  %v746_v50 = vpop.f32.mrb[3].mxu1  ;;  %v408_v53 = vadd.f32 %v376_v54, %v289_v52  ;;  %v2707_v54 = vld [vmem:[#allocation11_spill] sm:$0xff] }
 0x10f   :  { %v1648_v40 = vmul.f32 -1.442695, %v749_v37  ;;  %v1649_v43 = vmul.f32 -1.442695, %v751_v41  ;;  %v83_v47 = vpop.permute.xlu1 %82  ;;  %v2706_v50 = vld [vmem:[#allocation10_spill] sm:$0xff] }
 0x110   :  { %1747 = vpow2.f32 %v1647_v44  ;;  %v750_v61 = vadd.f32 %v741_v60, %v408_v53  ;;  %v2705_v44 = vmov 0   ;;  %v140_v48 = vmul.f32 %v2145_v45, %v83_v47  ;;  %v2708_v53 = vld [vmem:[#allocation12_spill] sm:$0xff] }
 0x111   :  { %1749 = vpow2.f32 %v1648_v40  ;;  %v141_v1 = vmul.f32 %v2706_v50, %v83_v47 }
 0x112   :  { %1751 = vpow2.f32 %v1649_v43  ;;  %v172_v43 = vadd.f32 %v140_v48, %v2708_v53 }
 0x113   :  { %1753 = vtanh.f32 %v750_v61  ;;  %v208_v52 = vpop.permute.xlu1 %207  ;;  %v2709_v61 = vld [vmem:[#allocation13_spill] sm:$0xff] }
 0x114   :  { %v259_v41 = vmul.f32 %v2707_v54, %v208_v52  ;;  %v2716_v54 = vld [vmem:[#allocation20_spill] sm:$0xff] }
 0x115   :  { %v142_v45 = vmul.f32 %v2716_v54, %v83_v47 }
 0x11a   :  { %v1748_v63 = vpop.eup %1747 }
 0x11b   :  { %v1750_v55 = vpop.eup %1749  ;;  %v755_v62 = vadd.f32 1.0, %v1748_v63  ;;  %v260_v63 = vmul.f32 %v2709_v61, %v208_v52 }
 0x11c   :  { %v761_v56 = vadd.f32 1.0, %v1750_v55  ;;  %v1752_v58 = vpop.eup %1751  ;;  %v327_v55 = vpop.permute.xlu0 %326 }
 0x11d   :  { %1755 = vrcp.f32 %v755_v62  ;;  %v1754_v59 = vpop.eup %1753  ;;  %v768_v34 = vadd.f32 1.0, %v1752_v58  ;;  %v2710_v62 = vld [vmem:[#allocation14_spill] sm:$0xff]  ;;  %v2711_v58 = vld [vmem:[#allocation15_spill] sm:$0xff] }
 0x11e   :  { %1757 = vrcp.f32 %v761_v56  ;;  %v173_v56 = vadd.f32 %v141_v1, %v2710_v62 }
 0x11f   :  { %1759 = vrcp.f32 %v768_v34 }
 0x120   :  { %v292_v34 = vadd.f32 %v260_v63, %v173_v56 }
 0x127   :  { %v1756_v37 = vpop.eup %1755 }
 0x128   :  { %v1758_v40 = vpop.eup %1757  ;;  %v772_v46 = vmul.f32 %v1756_v37, %v1754_v59  ;;  %v143_v59 = vmul.f32 %v2711_v58, %v83_v47  ;;  %v291_v37 = vadd.f32 %v259_v41, %v172_v43  ;;  %v381_v43 = vmul.f32 %v2189_v42, %v327_v55 }
 0x129   :  { %v771_v39 = vmul.f32 0.0, %v1758_v40  ;;  %v1760_v60 = vpop.eup %1759  ;;  %v2712_v40 = vld [vmem:[#allocation16_spill] sm:$0xff] }
 0x12b   :  { %v2202_v0 = vadd.f32 %v772_v46, %v771_v39  ;;  %v378_v46 = vmul.f32 %v2712_v40, %v327_v55  ;;  %v2713_v39 = vld [vmem:[#allocation17_spill] sm:$0xff] }
 0x12d   :  { %1761 = vtanh.f32 %v2202_v0  ;;  %v410_v48 = vadd.f32 %v378_v46, %v291_v37 }
 0x137   :  { %v1762_v29 = vpop.eup %1761 }
 0x138   :  { %v775_v38 = vmul.f32 %v1762_v29, %v1760_v60  ;;  %v379_v60 = vmul.f32 %v2713_v39, %v327_v55  ;;  %v2714_v29 = vld [vmem:[#allocation18_spill] sm:$0xff]  ;;  %v261_v39 = vmul.f32 %v2192_v57, %v208_v52 }
 0x13a   :  { %v781_v49 = vpack.c.bf16 %v775_v38, %v775_v38  ;;  %v262_v38 = vmul.f32 %v2714_v29, %v208_v52 }
 0x13c   :  { %815 = vmatmul.mubr.bf16.vlgmr.msra.gmra.mrb[4].mxu0 %v781_v49  ;;  %856 = vmatmul.mubr.bf16.vlgmr.msra.gmra.mrb[4].mxu1 %v781_v49  ;;  %v2715_v49 = vld [vmem:[#allocation19_spill] sm:$0xff] }
 0x13d   :  { %899 = vmatpush1.bf16.msra.mxu0 %v1996_v5  ;;  %940 = vmatpush1.bf16.msra.mxu1 %v1998_v6  ;;  %v175_v50 = vadd.f32 %v143_v59, %v2715_v49  ;;  %v174_v59 = vadd.f32 %v142_v45, %v2194_v51 }
 0x13e   :  { %900 = vmatprep.subr.bf16.mxu0 %v2001_v7  ;;  %941 = vmatprep.subr.bf16.mxu1 %v2005_v8 }
 0x13f   :  { %930 = vmatprep.mubr.bf16.mxu0 %v2705_v44  ;;  %971 = vmatprep.mubr.bf16.mxu1 %v2705_v44  ;;  %v294_v41 = vadd.f32 %v262_v38, %v175_v50 }
 0x141   :  { %901 = vmatpush1.bf16.msra.mxu0 %v2007_v9  ;;  %942 = vmatpush1.bf16.msra.mxu1 %v2010_v10  ;;  %v413_v46 = vadd.f32 %v381_v43, %v294_v41 }
 0x142   :  { %902 = vmatprep.subr.bf16.mxu0 %v2013_v11  ;;  %943 = vmatprep.subr.bf16.mxu1 %v2015_v12 }
 0x145   :  { %903 = vmatpush1.bf16.msra.mxu0 %v2017_v13  ;;  %944 = vmatpush1.bf16.msra.mxu1 %v2019_v14 }
 0x146   :  { %904 = vmatprep.subr.bf16.mxu0 %v2023_v15  ;;  %945 = vmatprep.subr.bf16.mxu1 %v2027_v16 }
 0x149   :  { %905 = vmatpush1.bf16.msra.mxu0 %v2029_v17  ;;  %946 = vmatpush1.bf16.msra.mxu1 %v2033_v18 }
 0x14a   :  { %906 = vmatprep.subr.bf16.mxu0 %v2035_v19  ;;  %947 = vmatprep.subr.bf16.mxu1 %v2039_v20 }
 0x14d   :  { %907 = vmatpush1.bf16.msra.mxu0 %v2041_v21  ;;  %948 = vmatpush1.bf16.msra.mxu1 %v2043_v22 }
 0x14e   :  { %908 = vmatprep.subr.bf16.mxu0 %v2047_v23  ;;  %949 = vmatprep.subr.bf16.mxu1 %v2051_v24 }
 0x151   :  { %909 = vmatpush1.bf16.msra.mxu0 %v2055_v25  ;;  %950 = vmatpush1.bf16.msra.mxu1 %v2057_v26 }
 0x152   :  { %910 = vmatprep.subr.bf16.mxu0 %v2061_v27  ;;  %951 = vmatprep.subr.bf16.mxu1 %v2063_v28 }
 0x155   :  { %911 = vmatpush1.bf16.msra.mxu0 %v2070_v30  ;;  %952 = vmatpush1.bf16.msra.mxu1 %v2072_v31 }
 0x156   :  { %912 = vmatprep.subr.bf16.mxu0 %v2076_v32  ;;  %953 = vmatprep.subr.bf16.mxu1 %v2078_v33 }
 0x159   :  { %913 = vmatpush1.bf16.msra.mxu0 %v2084_v35  ;;  %954 = vmatpush1.bf16.msra.mxu1 %v2086_v36 }
 0x15a   :  { %1014 = vmatprep.subr.bf16.mxu0 %v1991_v3  ;;  %1055 = vmatprep.subr.bf16.mxu1 %v1993_v4  ;;  %v411_v4 = vadd.f32 %v379_v60, %v292_v34  ;;  %v380_v34 = vmul.f32 %v2199_v2, %v327_v55 }
 0x20f   :  { %v816_v53 = vpop.f32.mrb[4].mxu0  ;;  %v857_v61 = vpop.f32.mrb[4].mxu1 }
 0x210   :  { %v864_v3 = vadd.f32 %v816_v53, %v410_v48  ;;  %v818_v1 = vpop.f32.mrb[5].mxu0  ;;  %v859_v62 = vpop.f32.mrb[5].mxu1  ;;  %v293_v53 = vadd.f32 %v261_v39, %v174_v59  ;;  %v2718_v59 = vld [vmem:[#allocation8_spill] sm:$0xff] }
 0x211   :  { %v865_v58 = vadd.f32 %v818_v1, %v411_v4  ;;  %v820_v63 = vpop.f32.mrb[6].mxu0  ;;  %v861_v56 = vpop.f32.mrb[6].mxu1  ;;  %v867_v4 = vadd.f32 %v859_v62, %v413_v46  ;;  %v2719_v46 = vmov 2  }
 0x212   :  { %v1650_v29 = vmul.f32 -1.442695, %v864_v3  ;;  %v821_v49 = vpop.f32.mrb[7].mxu0  ;;  %v862_v47 = vpop.f32.mrb[7].mxu1  ;;  %v412_v50 = vadd.f32 %v380_v34, %v293_v53  ;;  %v2720_v53 = vmov 1  }
 0x213   :  { %v1651_v37 = vmul.f32 -1.442695, %v865_v58  ;;  %v1652_v60 = vmul.f32 -1.442695, %v867_v4  ;;  %v43_v47 = vld [vmem:[%s2639_s0 + $0x18] sm:$0xff]  ;;  %v88_v34 = vpop.permute.xlu1 %87 }
 0x214   :  { %1763 = vpow2.f32 %v1650_v29  ;;  %v866_v38 = vadd.f32 %v857_v61, %v412_v50  ;;  %92 = vperm.xlu1 %1687, %v43_v47   ;;  %215 = vperm.xlu0 %1688, %v43_v47   ;;  %v2721_v4 = vld [vmem:[#allocation9_spill] sm:$0xff] }
 0x215   :  { %1765 = vpow2.f32 %v1651_v37  ;;  %v44_v37 = vld [vmem:[%s2639_s0 + $0x20] sm:$0xff]  ;;  %v144_v50 = vmul.f32 %v2721_v4, %v88_v34 }
 0x216   :  { %1767 = vpow2.f32 %v1652_v60  ;;  %v2722_v60 = vld [vmem:[#allocation10_spill] sm:$0xff] }
 0x217   :  { %1769 = vtanh.f32 %v866_v38  ;;  %v145_v38 = vmul.f32 %v2722_v60, %v88_v34  ;;  %v2730_v60 = vld [vmem:[#allocation19_spill] sm:$0xff] }
 0x218   :  { %1689 = vset.pattern.permute.xlu1 %v2719_v46  ;;  %219 = vperm.xlu0 %1688, %v44_v37  }
 0x219   :  { %334 = vperm.xlu1 %1689, %v43_v47   ;;  %v2728_v47 = vld [vmem:[#allocation17_spill] sm:$0xff] }
 0x21c   :  { %1692 = vset.pattern.permute.xlu0 %v2705_v44 }
 0x21d   :  { %1690 = vset.pattern.permute.xlu1 %v2705_v44 }
 0x21e   :  { %v1764_v48 = vpop.eup %1763  ;;  %97 = vperm.xlu1 %1690, %v44_v37  }
 0x21f   :  { %v1766_v1 = vpop.eup %1765  ;;  %v871_v63 = vadd.f32 1.0, %v1764_v48  ;;  %v212_v48 = vpop.permute.xlu1 %211 }
 0x220   :  { %v877_v3 = vadd.f32 1.0, %v1766_v1  ;;  %v1768_v45 = vpop.eup %1767  ;;  %v2723_v1 = vld [vmem:[#allocation11_spill] sm:$0xff] }
 0x221   :  { %1771 = vrcp.f32 %v871_v63  ;;  %v1770_v52 = vpop.eup %1769  ;;  %v884_v39 = vadd.f32 1.0, %v1768_v45  ;;  %v263_v63 = vmul.f32 %v2723_v1, %v212_v48  ;;  %v146_v1 = vmul.f32 %v2716_v54, %v88_v34 }
 0x222   :  { %1773 = vrcp.f32 %v877_v3  ;;  %1691 = vset.pattern.permute.xlu1 %v2719_v46  ;;  %v2724_v3 = vld [vmem:[#allocation12_spill] sm:$0xff] }
 0x223   :  { %1775 = vrcp.f32 %v884_v39  ;;  %338 = vperm.xlu1 %1691, %v44_v37   ;;  %v176_v45 = vadd.f32 %v144_v50, %v2724_v3 }
 0x227   :  { %1693 = vset.pattern.permute.xlu1 %v2720_v53  ;;  %v2729_v53 = vld [vmem:[#allocation18_spill] sm:$0xff] }
 0x228   :  { %v266_v46 = vmul.f32 %v2729_v53, %v212_v48 }
 0x22b   :  { %v1772_v58 = vpop.eup %1771 }
 0x22c   :  { %v1774_v29 = vpop.eup %1773  ;;  %v888_v49 = vmul.f32 %v1772_v58, %v1770_v52  ;;  %v2725_v52 = vld [vmem:[#allocation13_spill] sm:$0xff] }
 0x22d   :  { %v887_v55 = vmul.f32 %v1774_v29, %v2202_v0  ;;  %v1776_v61 = vpop.eup %1775  ;;  %v2717_v0 = vld [vmem:[#allocation7_spill] sm:$0xff]  ;;  %v264_v58 = vmul.f32 %v2725_v52, %v212_v48  ;;  %v331_v29 = vpop.permute.xlu0 %330 }
 0x22e   :  { %v383_v37 = vmul.f32 %v2728_v47, %v331_v29  ;;  %v265_v47 = vmul.f32 %v2192_v57, %v212_v48 }
 0x22f   :  { %v2256_v62 = vadd.f32 %v888_v49, %v887_v55  ;;  %v2726_v49 = vld [vmem:[#allocation14_spill] sm:$0xff]  ;;  %v2727_v55 = vld [vmem:[#allocation15_spill] sm:$0xff] }
 0x230   :  { %v177_v39 = vadd.f32 %v145_v38, %v2726_v49 }
 0x231   :  { %1777 = vtanh.f32 %v2256_v62 }
 0x23b   :  { %v1778_v41 = vpop.eup %1777 }
 0x23c   :  { %v891_v43 = vmul.f32 %v1778_v41, %v1776_v61  ;;  %v147_v61 = vmul.f32 %v2727_v55, %v88_v34  ;;  %v295_v41 = vadd.f32 %v263_v63, %v176_v45  ;;  %v385_v45 = vmul.f32 %v2189_v42, %v331_v29 }
 0x23e   :  { %v897_v56 = vpack.c.bf16 %v891_v43, %v891_v43  ;;  %v382_v43 = vmul.f32 %v2712_v40, %v331_v29  ;;  %v179_v4 = vadd.f32 %v147_v61, %v2730_v60  ;;  %v178_v61 = vadd.f32 %v146_v1, %v2194_v51 }
 0x240   :  { %931 = vmatmul.mubr.bf16.vlgmr.msra.gmra.mrb[8].mxu0 %v897_v56  ;;  %972 = vmatmul.mubr.bf16.vlgmr.msra.gmra.mrb[8].mxu1 %v897_v56  ;;  %v296_v56 = vadd.f32 %v264_v58, %v177_v39  ;;  %v414_v50 = vadd.f32 %v382_v43, %v295_v41  ;;  %v298_v63 = vadd.f32 %v266_v46, %v179_v4 }
 0x241   :  { %1015 = vmatpush1.bf16.msra.mxu0 %v1996_v5  ;;  %1056 = vmatpush1.bf16.msra.mxu1 %v1998_v6 }
 0x242   :  { %1016 = vmatprep.subr.bf16.mxu0 %v2001_v7  ;;  %1057 = vmatprep.subr.bf16.mxu1 %v2005_v8  ;;  %v417_v43 = vadd.f32 %v385_v45, %v298_v63 }
 0x243   :  { %1046 = vmatprep.mubr.bf16.mxu0 %v2705_v44  ;;  %1087 = vmatprep.mubr.bf16.mxu1 %v2705_v44 }
 0x245   :  { %1017 = vmatpush1.bf16.msra.mxu0 %v2007_v9  ;;  %1058 = vmatpush1.bf16.msra.mxu1 %v2010_v10 }
 0x246   :  { %1018 = vmatprep.subr.bf16.mxu0 %v2013_v11  ;;  %1059 = vmatprep.subr.bf16.mxu1 %v2015_v12 }
 0x249   :  { %1019 = vmatpush1.bf16.msra.mxu0 %v2017_v13  ;;  %1060 = vmatpush1.bf16.msra.mxu1 %v2019_v14 }
 0x24a   :  { %1020 = vmatprep.subr.bf16.mxu0 %v2023_v15  ;;  %1061 = vmatprep.subr.bf16.mxu1 %v2027_v16 }
 0x24d   :  { %1021 = vmatpush1.bf16.msra.mxu0 %v2029_v17  ;;  %1062 = vmatpush1.bf16.msra.mxu1 %v2033_v18 }
 0x24e   :  { %1022 = vmatprep.subr.bf16.mxu0 %v2035_v19  ;;  %1063 = vmatprep.subr.bf16.mxu1 %v2039_v20 }
 0x251   :  { %1023 = vmatpush1.bf16.msra.mxu0 %v2041_v21  ;;  %1064 = vmatpush1.bf16.msra.mxu1 %v2043_v22 }
 0x252   :  { %1024 = vmatprep.subr.bf16.mxu0 %v2047_v23  ;;  %1065 = vmatprep.subr.bf16.mxu1 %v2051_v24 }
 0x255   :  { %1025 = vmatpush1.bf16.msra.mxu0 %v2055_v25  ;;  %1066 = vmatpush1.bf16.msra.mxu1 %v2057_v26 }
 0x256   :  { %1026 = vmatprep.subr.bf16.mxu0 %v2061_v27  ;;  %1067 = vmatprep.subr.bf16.mxu1 %v2063_v28 }
 0x259   :  { %1027 = vmatpush1.bf16.msra.mxu0 %v2070_v30  ;;  %1068 = vmatpush1.bf16.msra.mxu1 %v2072_v31 }
 0x25a   :  { %1028 = vmatprep.subr.bf16.mxu0 %v2076_v32  ;;  %1069 = vmatprep.subr.bf16.mxu1 %v2078_v33 }
 0x25d   :  { %1029 = vmatpush1.bf16.msra.mxu0 %v2084_v35  ;;  %1070 = vmatpush1.bf16.msra.mxu1 %v2086_v36 }
 0x25e   :  { %1130 = vmatprep.subr.bf16.mxu0 %v2717_v0  ;;  %1171 = vmatprep.subr.bf16.mxu1 %v2718_v59  ;;  %v415_v59 = vadd.f32 %v383_v37, %v296_v56  ;;  %v384_v56 = vmul.f32 %v2199_v2, %v331_v29 }
 0x313   :  { %v932_v3 = vpop.f32.mrb[8].mxu0  ;;  %v973_v52 = vpop.f32.mrb[8].mxu1 }
 0x314   :  { %v980_v0 = vadd.f32 %v932_v3, %v414_v50  ;;  %v934_v38 = vpop.f32.mrb[9].mxu0  ;;  %v975_v49 = vpop.f32.mrb[9].mxu1  ;;  %v297_v3 = vadd.f32 %v265_v47, %v178_v61 }
 0x315   :  { %v981_v55 = vadd.f32 %v934_v38, %v415_v59  ;;  %v936_v58 = vpop.f32.mrb[10].mxu0  ;;  %v977_v39 = vpop.f32.mrb[10].mxu1  ;;  %v983_v59 = vadd.f32 %v975_v49, %v417_v43 }
 0x316   :  { %v1653_v53 = vmul.f32 -1.442695, %v980_v0  ;;  %v937_v60 = vpop.f32.mrb[11].mxu0  ;;  %v978_v34 = vpop.f32.mrb[11].mxu1  ;;  %v416_v46 = vadd.f32 %v384_v56, %v297_v3 }
 0x317   :  { %v1654_v41 = vmul.f32 -1.442695, %v981_v55  ;;  %v1655_v4 = vmul.f32 -1.442695, %v983_v59  ;;  %v2742_v34 = vld [vmem:[#allocation19_spill] sm:$0xff] }
 0x318   :  { %1779 = vpow2.f32 %v1653_v53  ;;  %v982_v37 = vadd.f32 %v973_v52, %v416_v46 }
 0x319   :  { %1781 = vpow2.f32 %v1654_v41 }
 0x31a   :  { %1783 = vpow2.f32 %v1655_v4 }
 0x31b   :  { %1785 = vtanh.f32 %v982_v37 }
 0x322   :  { %v1780_v50 = vpop.eup %1779 }
 0x323   :  { %v1782_v38 = vpop.eup %1781  ;;  %v987_v58 = vadd.f32 1.0, %v1780_v50 }
 0x324   :  { %v993_v0 = vadd.f32 1.0, %v1782_v38  ;;  %v1784_v60 = vpop.eup %1783 }
 0x325   :  { %1787 = vrcp.f32 %v987_v58  ;;  %v1786_v48 = vpop.eup %1785  ;;  %v1000_v47 = vadd.f32 1.0, %v1784_v60 }
 0x326   :  { %1789 = vrcp.f32 %v993_v0 }
 0x327   :  { %1791 = vrcp.f32 %v1000_v47 }
 0x32f   :  { %v1788_v53 = vpop.eup %1787 }
 0x330   :  { %v1790_v1 = vpop.eup %1789  ;;  %v1004_v55 = vmul.f32 %v1788_v53, %v1786_v48 }
 0x331   :  { %v1003_v29 = vmul.f32 %v1790_v1, %v2256_v62  ;;  %v1792_v52 = vpop.eup %1791  ;;  %v2741_v62 = vld [vmem:[#allocation18_spill] sm:$0xff] }
 0x333   :  { %v2321_v49 = vadd.f32 %v1004_v55, %v1003_v29 }
 0x335   :  { %1793 = vtanh.f32 %v2321_v49 }
 0x33f   :  { %v1794_v63 = vpop.eup %1793 }
 0x340   :  { %v1007_v45 = vmul.f32 %v1794_v63, %v1792_v52 }
 0x342   :  { %v1013_v39 = vpack.c.bf16 %v1007_v45, %v1007_v45 }
 0x344   :  { %1047 = vmatmul.mubr.bf16.vlgmr.msra.gmra.mrb[12].mxu0 %v1013_v39  ;;  %1088 = vmatmul.mubr.bf16.vlgmr.msra.gmra.mrb[12].mxu1 %v1013_v39 }
 0x345   :  { %1131 = vmatpush1.bf16.msra.mxu0 %v1996_v5  ;;  %1172 = vmatpush1.bf16.msra.mxu1 %v1998_v6  ;;  %v2731_v5 = vld [vmem:[#allocation7_spill] sm:$0xff]  ;;  %v2732_v6 = vld [vmem:[#allocation8_spill] sm:$0xff] }
 0x346   :  { %1132 = vmatprep.subr.bf16.mxu0 %v2001_v7  ;;  %1173 = vmatprep.subr.bf16.mxu1 %v2005_v8  ;;  %v93_v7 = vpop.permute.xlu1 %92  ;;  %v2733_v8 = vld [vmem:[#allocation9_spill] sm:$0xff] }
 0x347   :  { %1162 = vmatprep.mubr.bf16.mxu0 %v2705_v44  ;;  %1203 = vmatprep.mubr.bf16.mxu1 %v2705_v44  ;;  %v150_v43 = vmul.f32 %v2716_v54, %v93_v7 }
 0x349   :  { %1133 = vmatpush1.bf16.msra.mxu0 %v2007_v9  ;;  %1174 = vmatpush1.bf16.msra.mxu1 %v2010_v10  ;;  %v148_v9 = vmul.f32 %v2733_v8, %v93_v7  ;;  %v2734_v10 = vld [vmem:[#allocation10_spill] sm:$0xff]  ;;  %v182_v58 = vadd.f32 %v150_v43, %v2194_v51 }
 0x34a   :  { %1134 = vmatprep.subr.bf16.mxu0 %v2013_v11  ;;  %1175 = vmatprep.subr.bf16.mxu1 %v2015_v12  ;;  %v149_v11 = vmul.f32 %v2734_v10, %v93_v7  ;;  %v216_v12 = vpop.permute.xlu0 %215 }
 0x34b   :  { %v270_v61 = vmul.f32 %v2741_v62, %v216_v12  ;;  %v269_v50 = vmul.f32 %v2192_v57, %v216_v12 }
 0x34d   :  { %1135 = vmatpush1.bf16.msra.mxu0 %v2017_v13  ;;  %1176 = vmatpush1.bf16.msra.mxu1 %v2019_v14  ;;  %v2735_v13 = vld [vmem:[#allocation11_spill] sm:$0xff]  ;;  %v301_v45 = vadd.f32 %v269_v50, %v182_v58 }
 0x34e   :  { %1136 = vmatprep.subr.bf16.mxu0 %v2023_v15  ;;  %1177 = vmatprep.subr.bf16.mxu1 %v2027_v16  ;;  %v267_v14 = vmul.f32 %v2735_v13, %v216_v12  ;;  %v2736_v15 = vld [vmem:[#allocation12_spill] sm:$0xff]  ;;  %v2398_v50 = vld [vmem:[#allocation4 + $0x44] ss:$16 sps:$4 sm:$0xff]   ;;  %v2404_v58 = vld [vmem:[#allocation4 + $0x40] ss:$16 sps:$4 sm:$0xff]  }
 0x34f   :  { %v180_v16 = vadd.f32 %v148_v9, %v2736_v15 }
 0x351   :  { %1137 = vmatpush1.bf16.msra.mxu0 %v2029_v17  ;;  %1178 = vmatpush1.bf16.msra.mxu1 %v2033_v18  ;;  %v2737_v17 = vld [vmem:[#allocation13_spill] sm:$0xff] }
 0x352   :  { %1138 = vmatprep.subr.bf16.mxu0 %v2035_v19  ;;  %1179 = vmatprep.subr.bf16.mxu1 %v2039_v20  ;;  %v268_v18 = vmul.f32 %v2737_v17, %v216_v12  ;;  %v2738_v19 = vld [vmem:[#allocation14_spill] sm:$0xff] }
 0x353   :  { %v181_v20 = vadd.f32 %v149_v11, %v2738_v19 }
 0x355   :  { %1139 = vmatpush1.bf16.msra.mxu0 %v2041_v21  ;;  %1180 = vmatpush1.bf16.msra.mxu1 %v2043_v22  ;;  %v2739_v21 = vld [vmem:[#allocation15_spill] sm:$0xff] }
 0x356   :  { %1140 = vmatprep.subr.bf16.mxu0 %v2047_v23  ;;  %1181 = vmatprep.subr.bf16.mxu1 %v2051_v24  ;;  %v151_v22 = vmul.f32 %v2739_v21, %v93_v7  ;;  %v335_v23 = vpop.permute.xlu1 %334  ;;  %v299_v24 = vadd.f32 %v267_v14, %v180_v16 }
 0x357   :  { %v389_v37 = vmul.f32 %v2189_v42, %v335_v23  ;;  %v388_v39 = vmul.f32 %v2199_v2, %v335_v23 }
 0x358   :  { %v183_v41 = vadd.f32 %v151_v22, %v2742_v34 }
 0x359   :  { %1141 = vmatpush1.bf16.msra.mxu0 %v2055_v25  ;;  %1182 = vmatpush1.bf16.msra.mxu1 %v2057_v26  ;;  %v386_v25 = vmul.f32 %v2712_v40, %v335_v23  ;;  %v300_v26 = vadd.f32 %v268_v18, %v181_v20 }
 0x35a   :  { %1142 = vmatprep.subr.bf16.mxu0 %v2061_v27  ;;  %1183 = vmatprep.subr.bf16.mxu1 %v2063_v28  ;;  %v2740_v27 = vld [vmem:[#allocation17_spill] sm:$0xff]  ;;  %v302_v4 = vadd.f32 %v270_v61, %v183_v41 }
 0x35b   :  { %v387_v28 = vmul.f32 %v2740_v27, %v335_v23  ;;  %v418_v3 = vadd.f32 %v386_v25, %v299_v24 }
 0x35c   :  { %v421_v63 = vadd.f32 %v389_v37, %v302_v4  ;;  %v2392_v4 = vld [vmem:[#allocation4 + $0x20] ss:$16 sps:$4 sm:$0xff]   ;;  %v2395_v37 = vld [vmem:[#allocation4 + $0x28] ss:$16 sps:$4 sm:$0xff]  }
 0x35d   :  { %1143 = vmatpush1.bf16.msra.mxu0 %v2070_v30  ;;  %1184 = vmatpush1.bf16.msra.mxu1 %v2072_v31  ;;  %v419_v56 = vadd.f32 %v387_v28, %v300_v26 }
 0x35e   :  { %1144 = vmatprep.subr.bf16.mxu0 %v2076_v32  ;;  %1185 = vmatprep.subr.bf16.mxu1 %v2078_v33 }
 0x361   :  { %1145 = vmatpush1.bf16.msra.mxu0 %v2084_v35  ;;  %1186 = vmatpush1.bf16.msra.mxu1 %v2086_v36 }
 0x362   :  { %1246 = vmatprep.subr.bf16.mxu0 %v2731_v5  ;;  %1287 = vmatprep.subr.bf16.mxu1 %v2732_v6  ;;  %v420_v6 = vadd.f32 %v388_v39, %v301_v45  ;;  %v2437_v45 = vld [vmem:[#allocation4 + $0xac] ss:$16 sps:$4 sm:$0xff]   ;;  %v2440_v39 = vld [vmem:[#allocation4 + $0xa0] ss:$16 sps:$4 sm:$0xff]  }
 0x417   :  { %v1048_v59 = vpop.f32.mrb[12].mxu0  ;;  %v1089_v46 = vpop.f32.mrb[12].mxu1 }
 0x418   :  { %v1096_v38 = vadd.f32 %v1048_v59, %v418_v3  ;;  %v1050_v0 = vpop.f32.mrb[13].mxu0  ;;  %v1091_v60 = vpop.f32.mrb[13].mxu1  ;;  %v1098_v9 = vadd.f32 %v1089_v46, %v420_v6  ;;  %v2381_v59 = vld [vmem:[#allocation4 + $0x8] ss:$16 sps:$4 sm:$0xff]   ;;  %v2387_v46 = vld [vmem:[#allocation4 + $0x2c] ss:$16 sps:$4 sm:$0xff]  }
 0x419   :  { %v1097_v48 = vadd.f32 %v1050_v0, %v419_v56  ;;  %v1052_v53 = vpop.f32.mrb[14].mxu0  ;;  %v1093_v1 = vpop.f32.mrb[14].mxu1  ;;  %v1099_v5 = vadd.f32 %v1091_v60, %v421_v63  ;;  %v2378_v56 = vld [vmem:[#allocation4] ss:$16 sps:$4 sm:$0xff]   ;;  %v2407_v0 = vld [vmem:[#allocation4 + $0x48] ss:$16 sps:$4 sm:$0xff]  }
 0x41a   :  { %v1656_v55 = vmul.f32 -1.442695, %v1096_v38  ;;  %v1053_v47 = vpop.f32.mrb[15].mxu0  ;;  %v1094_v29 = vpop.f32.mrb[15].mxu1  ;;  %v2401_v38 = vld [vmem:[#allocation4 + $0x4c] ss:$16 sps:$4 sm:$0xff]  }
 0x41b   :  { %v1657_v52 = vmul.f32 -1.442695, %v1097_v48  ;;  %v1658_v7 = vmul.f32 -1.442695, %v1099_v5  ;;  %v2410_v60 = vld [vmem:[#allocation4 + $0x64] ss:$16 sps:$4 sm:$0xff]  }
 0x41c   :  { %1795 = vpow2.f32 %v1656_v55  ;;  %v2413_v48 = vld [vmem:[#allocation4 + $0x6c] ss:$16 sps:$4 sm:$0xff]   ;;  %v2416_v53 = vld [vmem:[#allocation4 + $0x60] ss:$16 sps:$4 sm:$0xff]   ;;  %v2419_v1 = vld [vmem:[#allocation4 + $0x68] ss:$16 sps:$4 sm:$0xff]  }
 0x41d   :  { %1797 = vpow2.f32 %v1657_v52  ;;  %v2422_v55 = vld [vmem:[#allocation4 + $0x84] ss:$16 sps:$4 sm:$0xff]   ;;  %v2425_v47 = vld [vmem:[#allocation4 + $0x8c] ss:$16 sps:$4 sm:$0xff]   ;;  %v2428_v29 = vld [vmem:[#allocation4 + $0x80] ss:$16 sps:$4 sm:$0xff]  }
 0x41e   :  { %1799 = vpow2.f32 %v1658_v7  ;;  %v2431_v52 = vld [vmem:[#allocation4 + $0x88] ss:$16 sps:$4 sm:$0xff]   ;;  %v2434_v63 = vld [vmem:[#allocation4 + $0xa4] ss:$16 sps:$4 sm:$0xff]   ;;  %v2449_v7 = vld [vmem:[#allocation4 + $0xcc] ss:$16 sps:$4 sm:$0xff]  }
 0x41f   :  { %1801 = vtanh.f32 %v1098_v9  ;;  %v2443_v5 = vld [vmem:[#allocation4 + $0xa8] ss:$16 sps:$4 sm:$0xff]   ;;  %v2446_v6 = vld [vmem:[#allocation4 + $0xc4] ss:$16 sps:$4 sm:$0xff]  }
 0x420   :  { %v2458_v9 = vld [vmem:[#allocation4 + $0x4] ss:$16 sps:$4 sm:$0xff]  }
 0x426   :  { %v1796_v11 = vpop.eup %1795 }
 0x427   :  { %v1798_v12 = vpop.eup %1797  ;;  %v1103_v14 = vadd.f32 1.0, %v1796_v11  ;;  %v2461_v11 = vld [vmem:[#allocation4 + $0xc] ss:$16 sps:$4 sm:$0xff]  }
 0x428   :  { %v1109_v16 = vadd.f32 1.0, %v1798_v12  ;;  %v1800_v18 = vpop.eup %1799 }
 0x429   :  { %1803 = vrcp.f32 %v1103_v14  ;;  %v1802_v20 = vpop.eup %1801  ;;  %v1116_v26 = vadd.f32 1.0, %v1800_v18  ;;  %v220_v14 = vpop.permute.xlu0 %219 }
 0x42a   :  { %1805 = vrcp.f32 %v1109_v16  ;;  %v271_v16 = vmul.f32 %v2735_v13, %v220_v14 }
 0x42b   :  { %1807 = vrcp.f32 %v1116_v26 }
 0x433   :  { %v1804_v22 = vpop.eup %1803 }
 0x434   :  { %v1806_v24 = vpop.eup %1805  ;;  %v1120_v25 = vmul.f32 %v1804_v22, %v1802_v20  ;;  %v272_v20 = vmul.f32 %v2737_v17, %v220_v14 }
 0x435   :  { %v1119_v23 = vmul.f32 %v1806_v24, %v2321_v49  ;;  %v1808_v61 = vpop.eup %1807  ;;  %v2384_v49 = vld [vmem:[#allocation4 + $0x24] ss:$16 sps:$4 sm:$0xff]  }
 0x437   :  { %v2375_v28 = vadd.f32 %v1120_v25, %v1119_v23 }
 0x439   :  { %1809 = vtanh.f32 %v2375_v28 }
 0x443   :  { %v1810_v41 = vpop.eup %1809 }
 0x444   :  { %v1123_v43 = vmul.f32 %v1810_v41, %v1808_v61 }
 0x446   :  { %v1129_v3 = vpack.c.bf16 %v1123_v43, %v1123_v43  ;;  %v274_v43 = vmul.f32 %v2741_v62, %v220_v14 }
 0x448   :  { %1163 = vmatmul.mubr.bf16.vlgmr.msra.gmra.mrb[16].mxu0 %v1129_v3  ;;  %1204 = vmatmul.mubr.bf16.vlgmr.msra.gmra.mrb[16].mxu1 %v1129_v3 }
 0x449   :  { %1247 = vmatpush1.bf16.msra.mxu0 %v2378_v56  ;;  %1288 = vmatpush1.bf16.msra.mxu1 %v2381_v59 }
 0x44a   :  { %1248 = vmatprep.subr.bf16.mxu0 %v2384_v49  ;;  %1289 = vmatprep.subr.bf16.mxu1 %v2387_v46 }
 0x44b   :  { %1278 = vmatprep.mubr.bf16.mxu0 %v2705_v44  ;;  %1319 = vmatprep.mubr.bf16.mxu1 %v2705_v44 }
 0x44d   :  { %1249 = vmatpush1.bf16.msra.mxu0 %v2392_v4  ;;  %1290 = vmatpush1.bf16.msra.mxu1 %v2395_v37 }
 0x44e   :  { %1250 = vmatprep.subr.bf16.mxu0 %v2398_v50  ;;  %1291 = vmatprep.subr.bf16.mxu1 %v2401_v38 }
 0x451   :  { %1251 = vmatpush1.bf16.msra.mxu0 %v2404_v58  ;;  %1292 = vmatpush1.bf16.msra.mxu1 %v2407_v0 }
 0x452   :  { %1252 = vmatprep.subr.bf16.mxu0 %v2410_v60  ;;  %1293 = vmatprep.subr.bf16.mxu1 %v2413_v48 }
 0x455   :  { %1253 = vmatpush1.bf16.msra.mxu0 %v2416_v53  ;;  %1294 = vmatpush1.bf16.msra.mxu1 %v2419_v1 }
 0x456   :  { %1254 = vmatprep.subr.bf16.mxu0 %v2422_v55  ;;  %1295 = vmatprep.subr.bf16.mxu1 %v2425_v47 }
 0x459   :  { %1255 = vmatpush1.bf16.msra.mxu0 %v2428_v29  ;;  %1296 = vmatpush1.bf16.msra.mxu1 %v2431_v52 }
 0x45a   :  { %1256 = vmatprep.subr.bf16.mxu0 %v2434_v63  ;;  %1297 = vmatprep.subr.bf16.mxu1 %v2437_v45 }
 0x45d   :  { %1257 = vmatpush1.bf16.msra.mxu0 %v2440_v39  ;;  %1298 = vmatpush1.bf16.msra.mxu1 %v2443_v5 }
 0x45e   :  { %1258 = vmatprep.subr.bf16.mxu0 %v2446_v6  ;;  %1299 = vmatprep.subr.bf16.mxu1 %v2449_v7 }
 0x461   :  { %1259 = vmatpush1.bf16.msra.mxu0 %v2070_v30  ;;  %1300 = vmatpush1.bf16.msra.mxu1 %v2072_v31  ;;  %v45_v30 = vld [vmem:[%s2639_s0 + $0x28] sm:$0xff]  ;;  %v46_v31 = vld [vmem:[%s2639_s0 + $0x30] sm:$0xff] }
 0x462   :  { %1260 = vmatprep.subr.bf16.mxu0 %v2076_v32  ;;  %1301 = vmatprep.subr.bf16.mxu1 %v2078_v33  ;;  %v2743_v32 = vmov 2   ;;  %v2744_v33 = vmov 1  }
 0x463   :  { %223 = vperm.xlu1 %1693, %v45_v30   ;;  %102 = vperm.xlu0 %1692, %v45_v30  }
 0x465   :  { %1261 = vmatpush1.bf16.msra.mxu0 %v2084_v35  ;;  %1302 = vmatpush1.bf16.msra.mxu1 %v2086_v36  ;;  %v98_v35 = vpop.permute.xlu1 %97 }
 0x466   :  { %1362 = vmatprep.subr.bf16.mxu0 %v2458_v9  ;;  %1403 = vmatprep.subr.bf16.mxu1 %v2461_v11  ;;  %v152_v36 = vmul.f32 %v2733_v8, %v98_v35  ;;  %v153_v12 = vmul.f32 %v2734_v10, %v98_v35  ;;  %v155_v25 = vmul.f32 %v2739_v21, %v98_v35 }
 0x467   :  { %1694 = vset.pattern.permute.xlu1 %v2743_v32  ;;  %107 = vperm.xlu0 %1692, %v46_v31  }
 0x468   :  { %342 = vperm.xlu1 %1694, %v45_v30   ;;  %v184_v18 = vadd.f32 %v152_v36, %v2736_v15  ;;  %v185_v24 = vadd.f32 %v153_v12, %v2738_v19  ;;  %v187_v3 = vadd.f32 %v155_v25, %v2742_v34  ;;  %v154_v30 = vmul.f32 %v2716_v54, %v98_v35 }
 0x469   :  { %v339_v22 = vpop.permute.xlu1 %338 }
 0x46a   :  { %v303_v26 = vadd.f32 %v271_v16, %v184_v18  ;;  %v390_v23 = vmul.f32 %v2712_v40, %v339_v22  ;;  %v304_v61 = vadd.f32 %v272_v20, %v185_v24  ;;  %v391_v41 = vmul.f32 %v2740_v27, %v339_v22 }
 0x46b   :  { %1696 = vset.pattern.permute.xlu0 %v2743_v32  ;;  %v306_v16 = vadd.f32 %v274_v43, %v187_v3  ;;  %v393_v18 = vmul.f32 %v2189_v42, %v339_v22  ;;  %v273_v27 = vmul.f32 %v2192_v57, %v220_v14  ;;  %v186_v25 = vadd.f32 %v154_v30, %v2194_v51 }
 0x46c   :  { %1695 = vset.pattern.permute.xlu1 %v2744_v33  ;;  %346 = vperm.xlu0 %1696, %v46_v31   ;;  %v423_v17 = vadd.f32 %v391_v41, %v304_v61  ;;  %v392_v41 = vmul.f32 %v2199_v2, %v339_v22 }
 0x46d   :  { %227 = vperm.xlu1 %1695, %v46_v31   ;;  %v422_v31 = vadd.f32 %v390_v23, %v303_v26  ;;  %v425_v23 = vadd.f32 %v393_v18, %v306_v16  ;;  %v305_v61 = vadd.f32 %v273_v27, %v186_v25  ;;  %v2523_v25 = vld [vmem:[#allocation4 + $0xc8] ss:$16 sps:$4 sm:$0xff]  }
 0x46f   :  { %v424_v43 = vadd.f32 %v392_v41, %v305_v61  ;;  %v2535_v61 = vld [vmem:[#allocation4 + $0xe8] ss:$16 sps:$4 sm:$0xff]  }
 0x470   :  { %v47_v41 = vld [vmem:[%s2639_s0 + $0x38] sm:$0xff] }
 0x471   :  { %1697 = vset.pattern.permute.xlu1 %v2705_v44  ;;  %350 = vperm.xlu0 %1696, %v47_v41  }
 0x472   :  { %112 = vperm.xlu1 %1697, %v47_v41  }
 0x476   :  { %1698 = vset.pattern.permute.xlu1 %v2744_v33 }
 0x477   :  { %231 = vperm.xlu1 %1698, %v47_v41  }
 0x51b   :  { %v1164_v32 = vpop.f32.mrb[16].mxu0  ;;  %v1205_v36 = vpop.f32.mrb[16].mxu1 }
 0x51c   :  { %v1212_v15 = vadd.f32 %v1164_v32, %v422_v31  ;;  %v1166_v12 = vpop.f32.mrb[17].mxu0  ;;  %v1207_v19 = vpop.f32.mrb[17].mxu1  ;;  %v1214_v31 = vadd.f32 %v1205_v36, %v424_v43 }
 0x51d   :  { %v1213_v21 = vadd.f32 %v1166_v12, %v423_v17  ;;  %v1168_v20 = vpop.f32.mrb[18].mxu0  ;;  %v1209_v24 = vpop.f32.mrb[18].mxu1  ;;  %v1215_v17 = vadd.f32 %v1207_v19, %v425_v23  ;;  %v2532_v23 = vld [vmem:[#allocation4 + $0xe0] ss:$16 sps:$4 sm:$0xff]  }
 0x51e   :  { %v1659_v62 = vmul.f32 -1.442695, %v1212_v15  ;;  %v1169_v34 = vpop.f32.mrb[19].mxu0  ;;  %v1210_v35 = vpop.f32.mrb[19].mxu1 }
 0x51f   :  { %v1660_v26 = vmul.f32 -1.442695, %v1213_v21  ;;  %v1661_v3 = vmul.f32 -1.442695, %v1215_v17  ;;  %v2526_v35 = vld [vmem:[#allocation4 + $0xe4] ss:$16 sps:$4 sm:$0xff]   ;;  %v103_v17 = vpop.permute.xlu0 %102 }
 0x520   :  { %1811 = vpow2.f32 %v1659_v62  ;;  %v156_v43 = vmul.f32 %v2733_v8, %v103_v17 }
 0x521   :  { %1813 = vpow2.f32 %v1660_v26  ;;  %v2529_v26 = vld [vmem:[#allocation4 + $0xec] ss:$16 sps:$4 sm:$0xff]  }
 0x522   :  { %1815 = vpow2.f32 %v1661_v3  ;;  %v224_v3 = vpop.permute.xlu1 %223 }
 0x523   :  { %1817 = vtanh.f32 %v1214_v31  ;;  %v157_v31 = vmul.f32 %v2734_v10, %v103_v17 }
 0x52a   :  { %v1812_v32 = vpop.eup %1811 }
 0x52b   :  { %v1814_v12 = vpop.eup %1813  ;;  %v1219_v20 = vadd.f32 1.0, %v1812_v32  ;;  %v275_v32 = vmul.f32 %v2735_v13, %v224_v3  ;;  %v158_v13 = vmul.f32 %v2716_v54, %v103_v17 }
 0x52c   :  { %v1225_v15 = vadd.f32 1.0, %v1814_v12  ;;  %v1816_v34 = vpop.eup %1815 }
 0x52d   :  { %1819 = vrcp.f32 %v1219_v20  ;;  %v1818_v21 = vpop.eup %1817  ;;  %v1232_v27 = vadd.f32 1.0, %v1816_v34 }
 0x52e   :  { %1821 = vrcp.f32 %v1225_v15  ;;  %v2747_v15 = vld [vmem:[#allocation14_spill] sm:$0xff] }
 0x52f   :  { %1823 = vrcp.f32 %v1232_v27  ;;  %v189_v34 = vadd.f32 %v157_v31, %v2747_v15 }
 0x537   :  { %v1820_v62 = vpop.eup %1819 }
 0x538   :  { %v1822_v14 = vpop.eup %1821  ;;  %v1236_v30 = vmul.f32 %v1820_v62, %v1818_v21  ;;  %v2748_v21 = vld [vmem:[#allocation15_spill] sm:$0xff] }
 0x539   :  { %v1235_v22 = vmul.f32 %v1822_v14, %v2375_v28  ;;  %v1824_v36 = vpop.eup %1823  ;;  %v2520_v28 = vld [vmem:[#allocation4 + $0xc0] ss:$16 sps:$4 sm:$0xff]   ;;  %v159_v62 = vmul.f32 %v2748_v21, %v103_v17  ;;  %v343_v14 = vpop.permute.xlu1 %342 }
 0x53a   :  { %v394_v33 = vmul.f32 %v2712_v40, %v343_v14 }
 0x53b   :  { %v2491_v19 = vadd.f32 %v1236_v30, %v1235_v22  ;;  %v2749_v22 = vld [vmem:[#allocation17_spill] sm:$0xff] }
 0x53d   :  { %1825 = vtanh.f32 %v2491_v19 }
 0x547   :  { %v1826_v16 = vpop.eup %1825 }
 0x548   :  { %v1239_v18 = vmul.f32 %v1826_v16, %v1824_v36  ;;  %v395_v36 = vmul.f32 %v2749_v22, %v343_v14  ;;  %v2750_v16 = vld [vmem:[#allocation18_spill] sm:$0xff]  ;;  %v277_v22 = vmul.f32 %v2192_v57, %v224_v3 }
 0x54a   :  { %v1245_v24 = vpack.c.bf16 %v1239_v18, %v1239_v18  ;;  %v278_v18 = vmul.f32 %v2750_v16, %v224_v3 }
 0x54c   :  { %1279 = vmatmul.mubr.bf16.vlgmr.msra.gmra.mrb[20].mxu0 %v1245_v24  ;;  %1320 = vmatmul.mubr.bf16.vlgmr.msra.gmra.mrb[20].mxu1 %v1245_v24  ;;  %v2751_v24 = vld [vmem:[#allocation19_spill] sm:$0xff] }
 0x54d   :  { %1363 = vmatpush1.bf16.msra.mxu0 %v2378_v56  ;;  %1404 = vmatpush1.bf16.msra.mxu1 %v2381_v59  ;;  %v191_v41 = vadd.f32 %v159_v62, %v2751_v24  ;;  %v190_v62 = vadd.f32 %v158_v13, %v2194_v51 }
 0x54e   :  { %1364 = vmatprep.subr.bf16.mxu0 %v2384_v49  ;;  %1405 = vmatprep.subr.bf16.mxu1 %v2387_v46 }
 0x54f   :  { %1394 = vmatprep.mubr.bf16.mxu0 %v2705_v44  ;;  %1435 = vmatprep.mubr.bf16.mxu1 %v2705_v44 }
 0x551   :  { %1365 = vmatpush1.bf16.msra.mxu0 %v2392_v4  ;;  %1406 = vmatpush1.bf16.msra.mxu1 %v2395_v37 }
 0x552   :  { %1366 = vmatprep.subr.bf16.mxu0 %v2398_v50  ;;  %1407 = vmatprep.subr.bf16.mxu1 %v2401_v38 }
 0x555   :  { %1367 = vmatpush1.bf16.msra.mxu0 %v2404_v58  ;;  %1408 = vmatpush1.bf16.msra.mxu1 %v2407_v0 }
 0x556   :  { %1368 = vmatprep.subr.bf16.mxu0 %v2410_v60  ;;  %1409 = vmatprep.subr.bf16.mxu1 %v2413_v48 }
 0x559   :  { %1369 = vmatpush1.bf16.msra.mxu0 %v2416_v53  ;;  %1410 = vmatpush1.bf16.msra.mxu1 %v2419_v1 }
 0x55a   :  { %1370 = vmatprep.subr.bf16.mxu0 %v2422_v55  ;;  %1411 = vmatprep.subr.bf16.mxu1 %v2425_v47 }
 0x55d   :  { %1371 = vmatpush1.bf16.msra.mxu0 %v2428_v29  ;;  %1412 = vmatpush1.bf16.msra.mxu1 %v2431_v52 }
 0x55e   :  { %1372 = vmatprep.subr.bf16.mxu0 %v2434_v63  ;;  %1413 = vmatprep.subr.bf16.mxu1 %v2437_v45 }
 0x561   :  { %1373 = vmatpush1.bf16.msra.mxu0 %v2440_v39  ;;  %1414 = vmatpush1.bf16.msra.mxu1 %v2443_v5 }
 0x562   :  { %1374 = vmatprep.subr.bf16.mxu0 %v2446_v6  ;;  %1415 = vmatprep.subr.bf16.mxu1 %v2449_v7 }
 0x565   :  { %1375 = vmatpush1.bf16.msra.mxu0 %v2520_v28  ;;  %1416 = vmatpush1.bf16.msra.mxu1 %v2523_v25 }
 0x566   :  { %1376 = vmatprep.subr.bf16.mxu0 %v2526_v35  ;;  %1417 = vmatprep.subr.bf16.mxu1 %v2529_v26 }
 0x569   :  { %1377 = vmatpush1.bf16.msra.mxu0 %v2532_v23  ;;  %1418 = vmatpush1.bf16.msra.mxu1 %v2535_v61 }
 0x56a   :  { %1478 = vmatprep.subr.bf16.mxu0 %v2458_v9  ;;  %1519 = vmatprep.subr.bf16.mxu1 %v2461_v11  ;;  %v2745_v9 = vld [vmem:[#allocation12_spill] sm:$0xff]  ;;  %v2746_v11 = vld [vmem:[#allocation13_spill] sm:$0xff] }
 0x56b   :  { %v188_v12 = vadd.f32 %v156_v43, %v2745_v9  ;;  %v276_v20 = vmul.f32 %v2746_v11, %v224_v3 }
 0x56d   :  { %v307_v30 = vadd.f32 %v275_v32, %v188_v12  ;;  %v308_v27 = vadd.f32 %v276_v20, %v189_v34  ;;  %v310_v32 = vadd.f32 %v278_v18, %v191_v41  ;;  %v397_v12 = vmul.f32 %v2189_v42, %v343_v14 }
 0x56f   :  { %v426_v43 = vadd.f32 %v394_v33, %v307_v30  ;;  %v427_v10 = vadd.f32 %v395_v36, %v308_v27  ;;  %v429_v33 = vadd.f32 %v397_v12, %v310_v32  ;;  %v396_v27 = vmul.f32 %v2199_v2, %v343_v14 }
 0x61f   :  { %v1280_v9 = vpop.f32.mrb[20].mxu0  ;;  %v1321_v11 = vpop.f32.mrb[20].mxu1 }
 0x620   :  { %v1328_v31 = vadd.f32 %v1280_v9, %v426_v43  ;;  %v1282_v15 = vpop.f32.mrb[21].mxu0  ;;  %v1323_v21 = vpop.f32.mrb[21].mxu1  ;;  %v309_v9 = vadd.f32 %v277_v22, %v190_v62 }
 0x621   :  { %v1329_v8 = vadd.f32 %v1282_v15, %v427_v10  ;;  %v1284_v20 = vpop.f32.mrb[22].mxu0  ;;  %v1325_v34 = vpop.f32.mrb[22].mxu1  ;;  %v1331_v10 = vadd.f32 %v1323_v21, %v429_v33 }
 0x622   :  { %v1662_v16 = vmul.f32 -1.442695, %v1328_v31  ;;  %v1285_v24 = vpop.f32.mrb[23].mxu0  ;;  %v1326_v17 = vpop.f32.mrb[23].mxu1  ;;  %v428_v15 = vadd.f32 %v396_v27, %v309_v9 }
 0x623   :  { %v1663_v30 = vmul.f32 -1.442695, %v1329_v8  ;;  %v1664_v36 = vmul.f32 -1.442695, %v1331_v10 }
 0x624   :  { %1827 = vpow2.f32 %v1662_v16  ;;  %v1330_v18 = vadd.f32 %v1321_v11, %v428_v15 }
 0x625   :  { %1829 = vpow2.f32 %v1663_v30 }
 0x626   :  { %1831 = vpow2.f32 %v1664_v36 }
 0x627   :  { %1833 = vtanh.f32 %v1330_v18 }
 0x62e   :  { %v1828_v41 = vpop.eup %1827 }
 0x62f   :  { %v1830_v43 = vpop.eup %1829  ;;  %v1335_v20 = vadd.f32 1.0, %v1828_v41 }
 0x630   :  { %v1341_v3 = vadd.f32 1.0, %v1830_v43  ;;  %v1832_v13 = vpop.eup %1831 }
 0x631   :  { %1835 = vrcp.f32 %v1335_v20  ;;  %v1834_v8 = vpop.eup %1833  ;;  %v1348_v22 = vadd.f32 1.0, %v1832_v13 }
 0x632   :  { %1837 = vrcp.f32 %v1341_v3 }
 0x633   :  { %1839 = vrcp.f32 %v1348_v22 }
 0x63b   :  { %v1836_v16 = vpop.eup %1835 }
 0x63c   :  { %v1838_v24 = vpop.eup %1837  ;;  %v1352_v31 = vmul.f32 %v1836_v16, %v1834_v8 }
 0x63d   :  { %v1351_v14 = vmul.f32 %v1838_v24, %v2491_v19  ;;  %v1840_v11 = vpop.eup %1839 }
 0x63f   :  { %v2561_v21 = vadd.f32 %v1352_v31, %v1351_v14 }
 0x641   :  { %1841 = vtanh.f32 %v2561_v21 }
 0x64b   :  { %v1842_v32 = vpop.eup %1841 }
 0x64c   :  { %v1355_v12 = vmul.f32 %v1842_v32, %v1840_v11 }
 0x64e   :  { %v1361_v34 = vpack.c.bf16 %v1355_v12, %v1355_v12 }
 0x650   :  { %1395 = vmatmul.mubr.bf16.vlgmr.msra.gmra.mrb[24].mxu0 %v1361_v34  ;;  %1436 = vmatmul.mubr.bf16.vlgmr.msra.gmra.mrb[24].mxu1 %v1361_v34 }
 0x651   :  { %1479 = vmatpush1.bf16.msra.mxu0 %v2378_v56  ;;  %1520 = vmatpush1.bf16.msra.mxu1 %v2381_v59  ;;  %v2752_v56 = vld [vmem:[#allocation9_spill] sm:$0xff] }
 0x652   :  { %1480 = vmatprep.subr.bf16.mxu0 %v2384_v49  ;;  %1521 = vmatprep.subr.bf16.mxu1 %v2387_v46  ;;  %v2753_v49 = vld [vmem:[#allocation10_spill] sm:$0xff] }
 0x653   :  { %1510 = vmatprep.mubr.bf16.mxu0 %v2705_v44  ;;  %1551 = vmatprep.mubr.bf16.mxu1 %v2705_v44  ;;  %v108_v44 = vpop.permute.xlu0 %107 }
 0x654   :  { %v160_v59 = vmul.f32 %v2752_v56, %v108_v44  ;;  %v161_v46 = vmul.f32 %v2753_v49, %v108_v44 }
 0x655   :  { %1481 = vmatpush1.bf16.msra.mxu0 %v2392_v4  ;;  %1522 = vmatpush1.bf16.msra.mxu1 %v2395_v37  ;;  %v228_v4 = vpop.permute.xlu1 %227  ;;  %v2754_v37 = vld [vmem:[#allocation11_spill] sm:$0xff] }
 0x656   :  { %1482 = vmatprep.subr.bf16.mxu0 %v2398_v50  ;;  %1523 = vmatprep.subr.bf16.mxu1 %v2401_v38  ;;  %v279_v50 = vmul.f32 %v2754_v37, %v228_v4  ;;  %v2755_v38 = vld [vmem:[#allocation12_spill] sm:$0xff]  ;;  %v281_v15 = vmul.f32 %v2192_v57, %v228_v4 }
 0x659   :  { %1483 = vmatpush1.bf16.msra.mxu0 %v2404_v58  ;;  %1524 = vmatpush1.bf16.msra.mxu1 %v2407_v0  ;;  %v192_v58 = vadd.f32 %v160_v59, %v2755_v38  ;;  %v2756_v0 = vld [vmem:[#allocation13_spill] sm:$0xff] }
 0x65a   :  { %1484 = vmatprep.subr.bf16.mxu0 %v2410_v60  ;;  %1525 = vmatprep.subr.bf16.mxu1 %v2413_v48  ;;  %v280_v60 = vmul.f32 %v2756_v0, %v228_v4  ;;  %v347_v48 = vpop.permute.xlu0 %346 }
 0x65b   :  { %v401_v9 = vmul.f32 %v2189_v42, %v347_v48  ;;  %v400_v8 = vmul.f32 %v2199_v2, %v347_v48 }
 0x65d   :  { %1485 = vmatpush1.bf16.msra.mxu0 %v2416_v53  ;;  %1526 = vmatpush1.bf16.msra.mxu1 %v2419_v1  ;;  %v2757_v53 = vld [vmem:[#allocation14_spill] sm:$0xff] }
 0x65e   :  { %1486 = vmatprep.subr.bf16.mxu0 %v2422_v55  ;;  %1527 = vmatprep.subr.bf16.mxu1 %v2425_v47  ;;  %v193_v1 = vadd.f32 %v161_v46, %v2757_v53  ;;  %v2758_v55 = vld [vmem:[#allocation15_spill] sm:$0xff] }
 0x65f   :  { %v163_v47 = vmul.f32 %v2758_v55, %v108_v44 }
 0x661   :  { %1487 = vmatpush1.bf16.msra.mxu0 %v2428_v29  ;;  %1528 = vmatpush1.bf16.msra.mxu1 %v2431_v52  ;;  %v311_v29 = vadd.f32 %v279_v50, %v192_v58  ;;  %v398_v52 = vmul.f32 %v2712_v40, %v347_v48 }
 0x662   :  { %1488 = vmatprep.subr.bf16.mxu0 %v2434_v63  ;;  %1529 = vmatprep.subr.bf16.mxu1 %v2437_v45  ;;  %v312_v63 = vadd.f32 %v280_v60, %v193_v1  ;;  %v2759_v45 = vld [vmem:[#allocation17_spill] sm:$0xff] }
 0x665   :  { %1489 = vmatpush1.bf16.msra.mxu0 %v2440_v39  ;;  %1530 = vmatpush1.bf16.msra.mxu1 %v2443_v5  ;;  %v399_v39 = vmul.f32 %v2759_v45, %v347_v48  ;;  %v2760_v5 = vld [vmem:[#allocation18_spill] sm:$0xff] }
 0x666   :  { %1490 = vmatprep.subr.bf16.mxu0 %v2446_v6  ;;  %1531 = vmatprep.subr.bf16.mxu1 %v2449_v7  ;;  %v282_v6 = vmul.f32 %v2760_v5, %v228_v4  ;;  %v2761_v7 = vld [vmem:[#allocation19_spill] sm:$0xff] }
 0x667   :  { %v195_v19 = vadd.f32 %v163_v47, %v2761_v7 }
 0x669   :  { %1491 = vmatpush1.bf16.msra.mxu0 %v2520_v28  ;;  %1532 = vmatpush1.bf16.msra.mxu1 %v2523_v25  ;;  %v162_v28 = vmul.f32 %v2716_v54, %v108_v44  ;;  %v430_v25 = vadd.f32 %v398_v52, %v311_v29  ;;  %v314_v33 = vadd.f32 %v282_v6, %v195_v19  ;;  %v113_v52 = vpop.permute.xlu1 %112 }
 0x66a   :  { %1492 = vmatprep.subr.bf16.mxu0 %v2526_v35  ;;  %1533 = vmatprep.subr.bf16.mxu1 %v2529_v26 }
 0x66b   :  { %v194_v18 = vadd.f32 %v162_v28, %v2194_v51  ;;  %v433_v3 = vadd.f32 %v401_v9, %v314_v33 }
 0x66d   :  { %1493 = vmatpush1.bf16.msra.mxu0 %v2532_v23  ;;  %1534 = vmatpush1.bf16.msra.mxu1 %v2535_v61  ;;  %v431_v23 = vadd.f32 %v399_v39, %v312_v63  ;;  %v313_v13 = vadd.f32 %v281_v15, %v194_v18  ;;  %v164_v63 = vmul.f32 %v2752_v56, %v113_v52  ;;  %v232_v6 = vpop.permute.xlu1 %231 }
 0x66e   :  { %v165_v39 = vmul.f32 %v2753_v49, %v113_v52  ;;  %v283_v19 = vmul.f32 %v2754_v37, %v232_v6  ;;  %v284_v28 = vmul.f32 %v2756_v0, %v232_v6  ;;  %v286_v49 = vmul.f32 %v2760_v5, %v232_v6 }
 0x66f   :  { %v432_v24 = vadd.f32 %v400_v8, %v313_v13  ;;  %v166_v37 = vmul.f32 %v2716_v54, %v113_v52 }
 0x723   :  { %v1396_v35 = vpop.f32.mrb[24].mxu0  ;;  %v1437_v26 = vpop.f32.mrb[24].mxu1 }
 0x724   :  { %v1444_v61 = vadd.f32 %v1396_v35, %v430_v25  ;;  %v1398_v62 = vpop.f32.mrb[25].mxu0  ;;  %v1439_v17 = vpop.f32.mrb[25].mxu1  ;;  %v1446_v22 = vadd.f32 %v1437_v26, %v432_v24  ;;  %v197_v35 = vadd.f32 %v165_v39, %v2757_v53  ;;  %v167_v26 = vmul.f32 %v2758_v55, %v113_v52 }
 0x725   :  { %v1445_v30 = vadd.f32 %v1398_v62, %v431_v23  ;;  %v1400_v27 = vpop.f32.mrb[26].mxu0  ;;  %v1441_v10 = vpop.f32.mrb[26].mxu1  ;;  %v1447_v16 = vadd.f32 %v1439_v17, %v433_v3 }
 0x726   :  { %v1665_v36 = vmul.f32 -1.442695, %v1444_v61  ;;  %v1401_v41 = vpop.f32.mrb[27].mxu0  ;;  %v1442_v43 = vpop.f32.mrb[27].mxu1  ;;  %v316_v56 = vadd.f32 %v284_v28, %v197_v35  ;;  %v199_v17 = vadd.f32 %v167_v26, %v2761_v7  ;;  %v198_v7 = vadd.f32 %v166_v37, %v2194_v51 }
 0x727   :  { %v1666_v20 = vmul.f32 -1.442695, %v1445_v30  ;;  %v1667_v31 = vmul.f32 -1.442695, %v1447_v16  ;;  %v351_v25 = vpop.permute.xlu0 %350 }
 0x728   :  { %1843 = vpow2.f32 %v1665_v36  ;;  %v402_v23 = vmul.f32 %v2712_v40, %v351_v25  ;;  %v403_v62 = vmul.f32 %v2759_v45, %v351_v25  ;;  %v405_v55 = vmul.f32 %v2189_v42, %v351_v25 }
 0x729   :  { %1845 = vpow2.f32 %v1666_v20  ;;  %v318_v10 = vadd.f32 %v286_v49, %v199_v17  ;;  %v285_v36 = vmul.f32 %v2192_v57, %v232_v6  ;;  %v404_v20 = vmul.f32 %v2199_v2, %v351_v25 }
 0x72a   :  { %1847 = vpow2.f32 %v1667_v31  ;;  %v435_v33 = vadd.f32 %v403_v62, %v316_v56 }
 0x72b   :  { %1849 = vtanh.f32 %v1446_v22  ;;  %v437_v43 = vadd.f32 %v405_v55, %v318_v10  ;;  %v317_v3 = vadd.f32 %v285_v36, %v198_v7 }
 0x72d   :  { %v436_v42 = vadd.f32 %v404_v20, %v317_v3 }
 0x732   :  { %v1844_v14 = vpop.eup %1843 }
 0x733   :  { %v1846_v11 = vpop.eup %1845  ;;  %v1451_v32 = vadd.f32 1.0, %v1844_v14 }
 0x734   :  { %v1457_v12 = vadd.f32 1.0, %v1846_v11  ;;  %v1848_v34 = vpop.eup %1847 }
 0x735   :  { %1851 = vrcp.f32 %v1451_v32  ;;  %v1850_v44 = vpop.eup %1849  ;;  %v1464_v50 = vadd.f32 1.0, %v1848_v34 }
 0x736   :  { %1853 = vrcp.f32 %v1457_v12 }
 0x737   :  { %1855 = vrcp.f32 %v1464_v50 }
 0x73f   :  { %v1852_v59 = vpop.eup %1851 }
 0x740   :  { %v1854_v46 = vpop.eup %1853  ;;  %v1468_v4 = vmul.f32 %v1852_v59, %v1850_v44 }
 0x741   :  { %v1467_v58 = vmul.f32 %v1854_v46, %v2561_v21  ;;  %v1856_v48 = vpop.eup %1855  ;;  %v196_v21 = vadd.f32 %v164_v63, %v2755_v38 }
 0x743   :  { %v2613_v60 = vadd.f32 %v1468_v4, %v1467_v58  ;;  %v315_v61 = vadd.f32 %v283_v19, %v196_v21  ;;  %v1671_v4 = vld [vmem:[%s2643_s4] ss:$0 sm:$0xff] }
 0x745   :  { %1857 = vtanh.f32 %v2613_v60  ;;  %v434_v38 = vadd.f32 %v402_v23, %v315_v61 }
 0x74f   :  { %v1858_v1 = vpop.eup %1857 }
 0x750   :  { %v1471_v47 = vmul.f32 %v1858_v1, %v1856_v48  ;;  %v1672_v48 = vld [vmem:[#allocation3] ss:$0 sm:$0xff] }
 0x752   :  { %v1477_v29 = vpack.c.bf16 %v1471_v47, %v1471_v47 }
 0x754   :  { %1511 = vmatmul.mubr.bf16.vlgmr.msra.gmra.mrb[28].mxu0 %v1477_v29  ;;  %1552 = vmatmul.mubr.bf16.vlgmr.msra.gmra.mrb[28].mxu1 %v1477_v29 }
 0x827   :  { %v1512_v30 = vpop.f32.mrb[28].mxu0  ;;  %v1553_v0 = vpop.f32.mrb[28].mxu1 }
 0x828   :  { %v1560_v9 = vadd.f32 %v1512_v30, %v434_v38  ;;  %v1514_v53 = vpop.f32.mrb[29].mxu0  ;;  %v1555_v27 = vpop.f32.mrb[29].mxu1  ;;  %v1562_v16 = vadd.f32 %v1553_v0, %v436_v42 }
 0x829   :  { %v1561_v40 = vadd.f32 %v1514_v53, %v435_v33  ;;  %v1516_v15 = vpop.f32.mrb[30].mxu0  ;;  %v1557_v45 = vpop.f32.mrb[30].mxu1  ;;  %v1563_v13 = vadd.f32 %v1555_v27, %v437_v43 }
 0x82a   :  { %v1668_v5 = vmul.f32 -1.442695, %v1560_v9  ;;  %v1517_v18 = vpop.f32.mrb[31].mxu0  ;;  %v1558_v54 = vpop.f32.mrb[31].mxu1 }
 0x82b   :  { %v1669_v41 = vmul.f32 -1.442695, %v1561_v40  ;;  %v1670_v8 = vmul.f32 -1.442695, %v1563_v13 }
 0x82c   :  { %1859 = vpow2.f32 %v1668_v5 }
 0x82d   :  { %1861 = vpow2.f32 %v1669_v41 }
 0x82e   :  { %1863 = vpow2.f32 %v1670_v8 }
 0x82f   :  { %1865 = vtanh.f32 %v1562_v16 }
 0x836   :  { %v1860_v24 = vpop.eup %1859 }
 0x837   :  { %v1862_v31 = vpop.eup %1861  ;;  %v1567_v22 = vadd.f32 1.0, %v1860_v24 }
 0x838   :  { %v1573_v57 = vadd.f32 1.0, %v1862_v31  ;;  %v1864_v51 = vpop.eup %1863 }
 0x839   :  { %1867 = vrcp.f32 %v1567_v22  ;;  %v1866_v14 = vpop.eup %1865  ;;  %v1580_v34 = vadd.f32 1.0, %v1864_v51 }
 0x83a   :  { %1869 = vrcp.f32 %v1573_v57 }
 0x83b   :  { %1871 = vrcp.f32 %v1580_v34 }
 0x843   :  { %v1868_v11 = vpop.eup %1867 }
 0x844   :  { %v1870_v32 = vpop.eup %1869  ;;  %v1584_v12 = vmul.f32 %v1868_v11, %v1866_v14 }
 0x845   :  { %v1583_v2 = vmul.f32 %v1870_v32, %v2613_v60  ;;  %v1872_v59 = vpop.eup %1871 }
 0x847   :  { %v1585_v44 = vadd.f32 %v1584_v12, %v1583_v2 }
 0x849   :  { %1873 = vtanh.f32 %v1585_v44 }
 0x853   :  { %v1874_v46 = vpop.eup %1873 }
 0x854   :  { %v1587_v50 = vmul.f32 %v1874_v46, %v1872_v59 }
 0x856   :  { %v1595_v58 = vmul.f32 %v1671_v4, %v1587_v50 }
 0x858   :  { %1596 = vadd.xlane.f32.xlu1 %v1595_v58 }
 0x8e5   :  { %v1597_v1 = vpop.xlane.xlu1 %1596 }
 0x8e6   :  { %v1605_v47 = vadd.f32 %v1672_v48, %v1597_v1 }
 0x8e8   :  { %1607 = vst.msk [vmem:[%s2645_s6] sm:$0xff] %vm1606_vm0, %v1605_v47 }
 0x8e9   :  { %1612 = vsyncpa [#allocation5], 1 }

</bundles_post_ra>
